<compile_context>
chip_gen: v7x
topology: tpu7x:2x2x1
jax: 0.10.0
libtpu: 0.0.40
codegen_flags: <defaults>
</compile_context>

<pallas_src>
import functools

import jax
import jax.numpy as jnp
from jax.experimental import pallas as pl
from jax.experimental.pallas import tpu as pltpu


# ----------------------------------------------------------------------------
# Tiled linear:  y = x @ w + b   (optional fused activation)
# ----------------------------------------------------------------------------
def _linear_kernel(x_ref, w_ref, b_ref, o_ref, acc_ref, *, activation, nk):
    k = pl.program_id(2)

    @pl.when(k == 0)
    def _():
        acc_ref[...] = jnp.zeros_like(acc_ref)

    acc_ref[...] += jnp.dot(x_ref[...], w_ref[...],
                            preferred_element_type=jnp.float32)

    @pl.when(k == nk - 1)
    def _():
        y = acc_ref[...] + b_ref[...]
        if activation == "relu":
            y = jnp.maximum(y, 0.0)
        elif activation == "gelu":
            y = jax.nn.gelu(y)
        o_ref[...] = y.astype(o_ref.dtype)


def linear(x, w, b, *, activation=None, tm=256, tn=256, tk=512):
    M, K = x.shape
    N = w.shape[1]
    tm = tm if M % tm == 0 else M
    tn = tn if N % tn == 0 else N
    tk = tk if K % tk == 0 else K
    nk = K // tk
    return pl.pallas_call(
        functools.partial(_linear_kernel, activation=activation, nk=nk),
        out_shape=jax.ShapeDtypeStruct((M, N), x.dtype),
        grid=(M // tm, N // tn, nk),
        in_specs=[
            pl.BlockSpec((tm, tk), lambda i, j, k: (i, k)),
            pl.BlockSpec((tk, tn), lambda i, j, k: (k, j)),
            pl.BlockSpec((1, tn), lambda i, j, k: (0, j)),
        ],
        out_specs=pl.BlockSpec((tm, tn), lambda i, j, k: (i, j)),
        scratch_shapes=[pltpu.VMEM((tm, tn), jnp.float32)],
        compiler_params=pltpu.CompilerParams(
            dimension_semantics=("parallel", "parallel", "arbitrary")),
    )(x, w, b.reshape(1, N))


# ----------------------------------------------------------------------------
# Tiled linear + residual-add + LayerNorm fused in the epilogue:
#   out = LayerNorm(res + x @ w + b)        (norm over the full output dim)
# ----------------------------------------------------------------------------
def _linear_res_ln_kernel(x_ref, w_ref, b_ref, r_ref, g_ref, bet_ref,
                          o_ref, acc_ref, *, eps, nk):
    k = pl.program_id(1)

    @pl.when(k == 0)
    def _():
        acc_ref[...] = jnp.zeros_like(acc_ref)

    acc_ref[...] += jnp.dot(x_ref[...], w_ref[...],
                            preferred_element_type=jnp.float32)

    @pl.when(k == nk - 1)
    def _():
        h = acc_ref[...] + b_ref[...] + r_ref[...]
        mean = jnp.mean(h, axis=-1, keepdims=True)
        var = jnp.mean(jnp.square(h - mean), axis=-1, keepdims=True)
        hn = (h - mean) * jax.lax.rsqrt(var + eps)
        o_ref[...] = (hn * g_ref[...] + bet_ref[...]).astype(o_ref.dtype)


def linear_residual_layernorm(x, w, b, res, gamma, beta, *,
                              eps=1e-5, tm=256, tk=512):
    M, K = x.shape
    N = w.shape[1]                      # LayerNorm is over N -> tn == N
    tm = tm if M % tm == 0 else M
    tk = tk if K % tk == 0 else K
    nk = K // tk
    return pl.pallas_call(
        functools.partial(_linear_res_ln_kernel, eps=eps, nk=nk),
        out_shape=jax.ShapeDtypeStruct((M, N), x.dtype),
        grid=(M // tm, nk),
        in_specs=[
            pl.BlockSpec((tm, tk), lambda i, k: (i, k)),
            pl.BlockSpec((tk, N), lambda i, k: (k, 0)),
            pl.BlockSpec((1, N), lambda i, k: (0, 0)),
            pl.BlockSpec((tm, N), lambda i, k: (i, 0)),
            pl.BlockSpec((1, N), lambda i, k: (0, 0)),
            pl.BlockSpec((1, N), lambda i, k: (0, 0)),
        ],
        out_specs=pl.BlockSpec((tm, N), lambda i, k: (i, 0)),
        scratch_shapes=[pltpu.VMEM((tm, N), jnp.float32)],
        compiler_params=pltpu.CompilerParams(
            dimension_semantics=("parallel", "arbitrary")),
    )(x, w, b.reshape(1, N), res, gamma.reshape(1, N), beta.reshape(1, N))


# ----------------------------------------------------------------------------
# Fully fused FFN block:  out = LayerNorm(x + relu(x @ W1 + b1) @ W2 + b2)
# Tiled over the FF axis (reduction of the 2nd matmul); the (tm, FF) hidden
# activation never leaves VMEM.
# ----------------------------------------------------------------------------
def _ffn_res_ln_kernel(x_ref, w1_ref, b1_ref, w2_ref, b2_ref, g_ref, bet_ref,
                       o_ref, acc_ref, *, activation, eps, nf):
    j = pl.program_id(1)

    @pl.when(j == 0)
    def _():
        acc_ref[...] = jnp.zeros_like(acc_ref)

    h = jnp.dot(x_ref[...], w1_ref[...], preferred_element_type=jnp.float32)
    h = h + b1_ref[...]
    if activation == "relu":
        h = jnp.maximum(h, 0.0)
    elif activation == "gelu":
        h = jax.nn.gelu(h)
    acc_ref[...] += jnp.dot(h, w2_ref[...], preferred_element_type=jnp.float32)

    @pl.when(j == nf - 1)
    def _():
        y = acc_ref[...] + b2_ref[...] + x_ref[...]     # residual == FFN input
        mean = jnp.mean(y, axis=-1, keepdims=True)
        var = jnp.mean(jnp.square(y - mean), axis=-1, keepdims=True)
        yn = (y - mean) * jax.lax.rsqrt(var + eps)
        o_ref[...] = (yn * g_ref[...] + bet_ref[...]).astype(o_ref.dtype)


def ffn_residual_layernorm(x, w1, b1, w2, b2, gamma, beta, *,
                           activation="relu", eps=1e-5, tm=256, tf=512):
    M, D = x.shape
    FF = w1.shape[1]
    tm = tm if M % tm == 0 else M
    tf = tf if FF % tf == 0 else FF
    nf = FF // tf
    return pl.pallas_call(
        functools.partial(_ffn_res_ln_kernel,
                          activation=activation, eps=eps, nf=nf),
        out_shape=jax.ShapeDtypeStruct((M, D), x.dtype),
        grid=(M // tm, nf),
        in_specs=[
            pl.BlockSpec((tm, D), lambda i, j: (i, 0)),
            pl.BlockSpec((D, tf), lambda i, j: (0, j)),
            pl.BlockSpec((1, tf), lambda i, j: (0, j)),
            pl.BlockSpec((tf, D), lambda i, j: (j, 0)),
            pl.BlockSpec((1, D), lambda i, j: (0, 0)),
            pl.BlockSpec((1, D), lambda i, j: (0, 0)),
            pl.BlockSpec((1, D), lambda i, j: (0, 0)),
        ],
        out_specs=pl.BlockSpec((tm, D), lambda i, j: (i, 0)),
        scratch_shapes=[pltpu.VMEM((tm, D), jnp.float32)],
        compiler_params=pltpu.CompilerParams(
            dimension_semantics=("parallel", "arbitrary")),
    )(x, w1, b1.reshape(1, FF), w2, b2.reshape(1, D),
      gamma.reshape(1, D), beta.reshape(1, D))


# ----------------------------------------------------------------------------
# Multi-head self-attention core.  One batch per grid step; the (T, 3*D) block
# is lane-dense; 1/sqrt(head_dim) is already folded into the Q projection.
# ----------------------------------------------------------------------------
def _mha_body(qkv_ref, mask_ref, o_ref, *, nhead, head_dim):
    D = nhead * head_dim
    outs = []
    for h in range(nhead):                               # static unroll over heads
        lo = h * head_dim
        qh = qkv_ref[0, :, lo:lo + head_dim]             # (T, Dh)
        kh = qkv_ref[0, :, D + lo:D + lo + head_dim]     # (T, Dh)
        vh = qkv_ref[0, :, 2 * D + lo:2 * D + lo + head_dim]
        s = jax.lax.dot_general(qh, kh, (((1,), (1,)), ((), ())),
                                preferred_element_type=jnp.float32)  # (T, T)
        if mask_ref is not None:
            s = s + mask_ref[...]
        s = s - jnp.max(s, axis=-1, keepdims=True)
        p = jnp.exp(s)
        p = p * pl.reciprocal(jnp.sum(p, axis=-1, keepdims=True), approx=True)
        outs.append(jnp.dot(p, vh, preferred_element_type=jnp.float32))
    # write lane-dense (T, D) rows directly
    o_ref[0] = jnp.concatenate(outs, axis=-1).astype(o_ref.dtype)


def _mha_kernel(qkv_ref, o_ref, *, nhead, head_dim):
    _mha_body(qkv_ref, None, o_ref, nhead=nhead, head_dim=head_dim)


def _mha_kernel_masked(qkv_ref, mask_ref, o_ref, *, nhead, head_dim):
    _mha_body(qkv_ref, mask_ref, o_ref, nhead=nhead, head_dim=head_dim)


def multi_head_self_attention(qkv, nhead, head_dim, mask=None):
    # qkv: (B, T, 3*D), batch-first.  Returns (B, T, D).
    B, T, threeD = qkv.shape
    D = nhead * head_dim
    if mask is None:
        kernel = functools.partial(_mha_kernel, nhead=nhead, head_dim=head_dim)
        in_specs = [pl.BlockSpec((1, T, threeD), lambda b: (b, 0, 0))]
        args = (qkv,)
    else:
        kernel = functools.partial(_mha_kernel_masked,
                                   nhead=nhead, head_dim=head_dim)
        in_specs = [pl.BlockSpec((1, T, threeD), lambda b: (b, 0, 0)),
                    pl.BlockSpec((T, T), lambda b: (0, 0))]
        args = (qkv, mask)
    return pl.pallas_call(
        kernel,
        out_shape=jax.ShapeDtypeStruct((B, T, D), qkv.dtype),
        grid=(B,),
        in_specs=in_specs,
        out_specs=pl.BlockSpec((1, T, D), lambda b: (b, 0, 0)),
        compiler_params=pltpu.CompilerParams(
            dimension_semantics=("parallel",)),
    )(*args)


# ----------------------------------------------------------------------------
# Encoder layer (post-norm, eval mode -> dropout identity)
# ----------------------------------------------------------------------------
def transformer_encoder_layer(src, params, *, nhead, src_mask=None,
                              activation="relu", eps=1e-5):
    # src: (T, B, D) — PyTorch default batch_first=False layout.
    T, B, D = src.shape
    head_dim = D // nhead
    # batch-first rows internally: one transpose at the boundary only.
    x = src.transpose(1, 0, 2).reshape(B * T, D)

    # fused QKV projection (scale folded into Wq / bq)
    qkv = linear(x, params["w_qkv"], params["b_qkv"])              # (B*T, 3D)
    attn = multi_head_self_attention(qkv.reshape(B, T, 3 * D),
                                     nhead, head_dim, mask=src_mask)  # (B, T, D)

    # out-projection + residual + LayerNorm1, fused epilogue
    x = linear_residual_layernorm(attn.reshape(B * T, D),
                                  params["w_o"], params["b_o"],
                                  x, params["ln1_w"], params["ln1_b"], eps=eps)

    # FFN + residual + LayerNorm2, fully fused (hidden stays in VMEM)
    x = ffn_residual_layernorm(x, params["ff_w1"], params["ff_b1"],
                               params["ff_w2"], params["ff_b2"],
                               params["ln2_w"], params["ln2_b"],
                               activation=activation, eps=eps)

    return x.reshape(B, T, D).transpose(1, 0, 2)


# ----------------------------------------------------------------------------
# Parameter init (deterministic)
# ----------------------------------------------------------------------------
def init_encoder_layer_params(key, d_model, nhead, dim_feedforward):
    D, FF = d_model, dim_feedforward
    ks = jax.random.split(key, 6)
    w = lambda k, s: jax.random.normal(k, s, jnp.float32) * 0.05
    z = lambda n: jnp.zeros((n,), jnp.float32)
    ones = lambda n: jnp.ones((n,), jnp.float32)
    scale = 1.0 / ((D // nhead) ** 0.5)
    wq, wk, wv = w(ks[0], (D, D)), w(ks[1], (D, D)), w(ks[2], (D, D))
    bq, bk, bv = z(D), z(D), z(D)
    return dict(
        # 1/sqrt(head_dim) folded into the Q projection (removes a (T,S) VALU pass)
        w_qkv=jnp.concatenate([wq * scale, wk, wv], axis=1),
        b_qkv=jnp.concatenate([bq * scale, bk, bv]),
        w_o=w(ks[3], (D, D)), b_o=z(D),
        ff_w1=w(ks[4], (D, FF)), ff_b1=z(FF),
        ff_w2=w(ks[5], (FF, D)), ff_b2=z(D),
        ln1_w=ones(D), ln1_b=z(D),
        ln2_w=ones(D), ln2_b=z(D),
    )


# ----------------------------------------------------------------------------
# Pure-JAX reference (for a correctness sanity check)
# ----------------------------------------------------------------------------
def _reference(src, p, nhead, mask=None, eps=1e-5):
    T, B, D = src.shape
    Dh = D // nhead
    x = src.transpose(1, 0, 2).reshape(B * T, D)
    qkv = (x @ p["w_qkv"] + p["b_qkv"]).reshape(B, T, 3, nhead, Dh)
    q, k, v = qkv[:, :, 0], qkv[:, :, 1], qkv[:, :, 2]      # (B, T, H, Dh)
    s = jnp.einsum("bthd,bshd->bhts", q, k)                 # scale already folded in
    if mask is not None:
        s = s + mask
    a = jax.nn.softmax(s, axis=-1)
    o = jnp.einsum("bhts,bshd->bthd", a, v).reshape(B * T, D)
    h = o @ p["w_o"] + p["b_o"] + x
    h = (h - h.mean(-1, keepdims=True)) * jax.lax.rsqrt(h.var(-1, keepdims=True) + eps)
    x = h * p["ln1_w"] + p["ln1_b"]
    f = jnp.maximum(x @ p["ff_w1"] + p["ff_b1"], 0.0) @ p["ff_w2"] + p["ff_b2"] + x
    f = (f - f.mean(-1, keepdims=True)) * jax.lax.rsqrt(f.var(-1, keepdims=True) + eps)
    x = f * p["ln2_w"] + p["ln2_b"]
    return x.reshape(B, T, D).transpose(1, 0, 2)


# ----------------------------------------------------------------------------
# Main
# ----------------------------------------------------------------------------
if __name__ == "__main__":
    T, B, D, H, FF = 16, 2, 128, 4, 256     # small, lane-aligned (D, FF multiples of 128)

    key = jax.random.PRNGKey(0)
    k_src, k_par = jax.random.split(key)
    src = jax.random.normal(k_src, (T, B, D), jnp.float32)   # (seq, batch, d_model)
    params = init_encoder_layer_params(k_par, D, H, FF)

    fwd = jax.jit(functools.partial(transformer_encoder_layer, nhead=H))

    # no mask (typical encoder usage)
    out = jax.block_until_ready(fwd(src, params))
    assert out.shape == (T, B, D)
    assert bool(jnp.all(jnp.isfinite(out)))
    ref = _reference(src, params, H)
    assert bool(jnp.allclose(out, ref, atol=2e-2, rtol=2e-2))

    # with an additive (causal) src_mask
    neg = jnp.float32(-1e9)
    causal = jnp.where(jnp.tril(jnp.ones((T, T), jnp.bool_)), 0.0, neg)
    out_m = jax.block_until_ready(
        transformer_encoder_layer(src, params, nhead=H, src_mask=causal))
    assert out_m.shape == (T, B, D)
    assert bool(jnp.all(jnp.isfinite(out_m)))
    ref_m = _reference(src, params, H, mask=causal)
    assert bool(jnp.allclose(out_m, ref_m, atol=2e-2, rtol=2e-2))

    print("KERNEL_OK")
</pallas_src>

<mosaic_0001>
module attributes {stable_mosaic.version = 11 : i64} {
  func.func @_linear_kernel(%arg0: i32, %arg1: i32, %arg2: i32, %arg3: memref<32x128xf32, #tpu.memory_space<vmem>>, %arg4: memref<128x384xf32, #tpu.memory_space<vmem>>, %arg5: memref<1x384xf32, #tpu.memory_space<vmem>>, %arg6: memref<32x384xf32, #tpu.memory_space<vmem>>, %arg7: memref<32x384xf32, #tpu.memory_space<vmem>>) attributes {dimension_semantics = [#tpu.dimension_semantics<parallel>, #tpu.dimension_semantics<parallel>, #tpu.dimension_semantics<arbitrary>], iteration_bounds = array<i64: 1, 1, 1>, scalar_prefetch = 0 : i64, scratch_operands = 1 : i64, tpu.core_type = #tpu.core_type<tc>, window_params = [{transform_indices = @transform_0, window_bounds = array<i64: 32, 128>}, {transform_indices = @transform_1, window_bounds = array<i64: 128, 384>}, {transform_indices = @transform_2, window_bounds = array<i64: 1, 384>}, {transform_indices = @transform_3, window_bounds = array<i64: 32, 384>}]} {
    %c0_i32 = arith.constant 0 : i32
    %0 = arith.cmpi eq, %arg2, %c0_i32 : i32
    %1 = arith.extui %0 : i1 to i32
    %c0_i32_0 = arith.constant 0 : i32
    %2 = arith.cmpi ne, %1, %c0_i32_0 : i32
    scf.if %2 {
      %cst_10 = arith.constant 0.000000e+00 : f32
      %12 = vector.broadcast %cst_10 : f32 to vector<32x384xf32>
      %c0_11 = arith.constant 0 : index
      %c0_12 = arith.constant 0 : index
      %13 = vector.load %arg7[%c0_11, %c0_12] : memref<32x384xf32, #tpu.memory_space<vmem>>, vector<32x384xf32>
      tpu.vector_store %arg7[%c0_11, %c0_12], %12 {strides = array<i32>} : memref<32x384xf32, #tpu.memory_space<vmem>>, vector<32x384xf32>,
    } else {
    }
    %c0 = arith.constant 0 : index
    %c0_1 = arith.constant 0 : index
    %3 = vector.load %arg7[%c0, %c0_1] : memref<32x384xf32, #tpu.memory_space<vmem>>, vector<32x384xf32>
    %c0_2 = arith.constant 0 : index
    %c0_3 = arith.constant 0 : index
    %4 = vector.load %arg3[%c0_2, %c0_3] : memref<32x128xf32, #tpu.memory_space<vmem>>, vector<32x128xf32>
    %c0_4 = arith.constant 0 : index
    %c0_5 = arith.constant 0 : index
    %5 = vector.load %arg4[%c0_4, %c0_5] : memref<128x384xf32, #tpu.memory_space<vmem>>, vector<128x384xf32>
    %cst = arith.constant dense<0.000000e+00> : vector<32x384xf32>
    %6 = tpu.matmul %4, %5, %cst {dimension_numbers = #tpu.dot_dimension_numbers<[1], [0], [0], [1], [0, 0, 1, 1], [], []>} : vector<32x128xf32>, vector<128x384xf32>, vector<32x384xf32> -> vector<32x384xf32>
    %7 = arith.addf %3, %6 : vector<32x384xf32>
    %c0_6 = arith.constant 0 : index
    %c0_7 = arith.constant 0 : index
    %8 = vector.load %arg7[%c0_6, %c0_7] : memref<32x384xf32, #tpu.memory_space<vmem>>, vector<32x384xf32>
    tpu.vector_store %arg7[%c0_6, %c0_7], %7 {strides = array<i32>} : memref<32x384xf32, #tpu.memory_space<vmem>>, vector<32x384xf32>,
    %c0_i32_8 = arith.constant 0 : i32
    %9 = arith.cmpi eq, %arg2, %c0_i32_8 : i32
    %10 = arith.extui %9 : i1 to i32
    %c0_i32_9 = arith.constant 0 : i32
    %11 = arith.cmpi ne, %10, %c0_i32_9 : i32
    scf.if %11 {
      %c0_10 = arith.constant 0 : index
      %c0_11 = arith.constant 0 : index
      %12 = vector.load %arg7[%c0_10, %c0_11] : memref<32x384xf32, #tpu.memory_space<vmem>>, vector<32x384xf32>
      %c0_12 = arith.constant 0 : index
      %c0_13 = arith.constant 0 : index
      %13 = vector.load %arg5[%c0_12, %c0_13] : memref<1x384xf32, #tpu.memory_space<vmem>>, vector<1x384xf32>
      %14 = vector.broadcast %13 : vector<1x384xf32> to vector<32x384xf32>
      %15 = arith.addf %12, %14 : vector<32x384xf32>
      %c0_14 = arith.constant 0 : index
      %c0_15 = arith.constant 0 : index
      %16 = vector.load %arg6[%c0_14, %c0_15] : memref<32x384xf32, #tpu.memory_space<vmem>>, vector<32x384xf32>
      tpu.vector_store %arg6[%c0_14, %c0_15], %15 {strides = array<i32>} : memref<32x384xf32, #tpu.memory_space<vmem>>, vector<32x384xf32>,
    } else {
    }
    return
  }
  func.func @transform_0(%arg0: i32, %arg1: i32, %arg2: i32) -> (i32, i32) {
    %c0_i32 = arith.constant 0 : i32
    return %arg0, %arg2 : i32, i32
  }
  func.func @transform_1(%arg0: i32, %arg1: i32, %arg2: i32) -> (i32, i32) {
    %c0_i32 = arith.constant 0 : i32
    return %arg2, %arg1 : i32, i32
  }
  func.func @transform_2(%arg0: i32, %arg1: i32, %arg2: i32) -> (i32, i32) {
    %c0_i32 = arith.constant 0 : i32
    %c0_i32_0 = arith.constant 0 : i32
    return %c0_i32, %arg1 : i32, i32
  }
  func.func @transform_3(%arg0: i32, %arg1: i32, %arg2: i32) -> (i32, i32) {
    %c0_i32 = arith.constant 0 : i32
    return %arg0, %arg1 : i32, i32
  }
}

module attributes {stable_mosaic.version = 11 : i64} {
  func.func @_mha_kernel(%arg0: i32, %arg1: memref<1x16x384xf32, #tpu.memory_space<vmem>>, %arg2: memref<1x16x128xf32, #tpu.memory_space<vmem>>) attributes {dimension_semantics = [#tpu.dimension_semantics<parallel>], iteration_bounds = array<i64: 2>, scalar_prefetch = 0 : i64, scratch_operands = 0 : i64, tpu.core_type = #tpu.core_type<tc>, window_params = [{transform_indices = @transform_0, window_bounds = array<i64: 1, 16, 384>}, {transform_indices = @transform_1, window_bounds = array<i64: 1, 16, 128>}]} {
    %c0 = arith.constant 0 : index
    %c0_0 = arith.constant 0 : index
    %c0_1 = arith.constant 0 : index
    %0 = vector.load %arg1[%c0, %c0_0, %c0_1] : memref<1x16x384xf32, #tpu.memory_space<vmem>>, vector<1x16x32xf32>
    %1 = vector.shape_cast %0 : vector<1x16x32xf32> to vector<16x32xf32>
    %c0_2 = arith.constant 0 : index
    %c0_3 = arith.constant 0 : index
    %c128 = arith.constant 128 : index
    %2 = vector.load %arg1[%c0_2, %c0_3, %c128] : memref<1x16x384xf32, #tpu.memory_space<vmem>>, vector<1x16x32xf32>
    %3 = vector.shape_cast %2 : vector<1x16x32xf32> to vector<16x32xf32>
    %c0_4 = arith.constant 0 : index
    %c0_5 = arith.constant 0 : index
    %c256 = arith.constant 256 : index
    %4 = vector.load %arg1[%c0_4, %c0_5, %c256] : memref<1x16x384xf32, #tpu.memory_space<vmem>>, vector<1x16x32xf32>
    %5 = vector.shape_cast %4 : vector<1x16x32xf32> to vector<16x32xf32>
    %cst = arith.constant dense<0.000000e+00> : vector<16x16xf32>
    %6 = tpu.matmul %1, %3, %cst {dimension_numbers = #tpu.dot_dimension_numbers<[1], [1], [0], [0], [0, 0, 1, 0], [], []>} : vector<16x32xf32>, vector<16x32xf32>, vector<16x16xf32> -> vector<16x16xf32>
    %cst_6 = arith.constant dense<0xFF800000> : vector<16xf32>
    %7 = vector.multi_reduction <maximumf>, %6, %cst_6 [1] : vector<16x16xf32> to vector<16xf32>
    %8 = vector.shape_cast %7 : vector<16xf32> to vector<16x1xf32>
    %9 = vector.broadcast %8 : vector<16x1xf32> to vector<16x16xf32>
    %10 = arith.subf %6, %9 : vector<16x16xf32>
    %11 = math.exp %10 : vector<16x16xf32>
    %cst_7 = arith.constant dense<0.000000e+00> : vector<16xf32>
    %12 = vector.multi_reduction <add>, %11, %cst_7 [1] : vector<16x16xf32> to vector<16xf32>
    %13 = vector.shape_cast %12 : vector<16xf32> to vector<16x1xf32>
    %14 = tpu.reciprocal %13 {approx = true} : vector<16x1xf32> -> vector<16x1xf32>
    %15 = vector.broadcast %14 : vector<16x1xf32> to vector<16x16xf32>
    %16 = arith.mulf %11, %15 : vector<16x16xf32>
    %cst_8 = arith.constant dense<0.000000e+00> : vector<16x32xf32>
    %17 = tpu.matmul %16, %5, %cst_8 {dimension_numbers = #tpu.dot_dimension_numbers<[1], [0], [0], [1], [0, 0, 1, 1], [], []>} : vector<16x16xf32>, vector<16x32xf32>, vector<16x32xf32> -> vector<16x32xf32>
    %c0_9 = arith.constant 0 : index
    %c0_10 = arith.constant 0 : index
    %c32 = arith.constant 32 : index
    %18 = vector.load %arg1[%c0_9, %c0_10, %c32] : memref<1x16x384xf32, #tpu.memory_space<vmem>>, vector<1x16x32xf32>
    %19 = vector.shape_cast %18 : vector<1x16x32xf32> to vector<16x32xf32>
    %c0_11 = arith.constant 0 : index
    %c0_12 = arith.constant 0 : index
    %c160 = arith.constant 160 : index
    %20 = vector.load %arg1[%c0_11, %c0_12, %c160] : memref<1x16x384xf32, #tpu.memory_space<vmem>>, vector<1x16x32xf32>
    %21 = vector.shape_cast %20 : vector<1x16x32xf32> to vector<16x32xf32>
    %c0_13 = arith.constant 0 : index
    %c0_14 = arith.constant 0 : index
    %c288 = arith.constant 288 : index
    %22 = vector.load %arg1[%c0_13, %c0_14, %c288] : memref<1x16x384xf32, #tpu.memory_space<vmem>>, vector<1x16x32xf32>
    %23 = vector.shape_cast %22 : vector<1x16x32xf32> to vector<16x32xf32>
    %cst_15 = arith.constant dense<0.000000e+00> : vector<16x16xf32>
    %24 = tpu.matmul %19, %21, %cst_15 {dimension_numbers = #tpu.dot_dimension_numbers<[1], [1], [0], [0], [0, 0, 1, 0], [], []>} : vector<16x32xf32>, vector<16x32xf32>, vector<16x16xf32> -> vector<16x16xf32>
    %cst_16 = arith.constant dense<0xFF800000> : vector<16xf32>
    %25 = vector.multi_reduction <maximumf>, %24, %cst_16 [1] : vector<16x16xf32> to vector<16xf32>
    %26 = vector.shape_cast %25 : vector<16xf32> to vector<16x1xf32>
    %27 = vector.broadcast %26 : vector<16x1xf32> to vector<16x16xf32>
    %28 = arith.subf %24, %27 : vector<16x16xf32>
    %29 = math.exp %28 : vector<16x16xf32>
    %cst_17 = arith.constant dense<0.000000e+00> : vector<16xf32>
    %30 = vector.multi_reduction <add>, %29, %cst_17 [1] : vector<16x16xf32> to vector<16xf32>
    %31 = vector.shape_cast %30 : vector<16xf32> to vector<16x1xf32>
    %32 = tpu.reciprocal %31 {approx = true} : vector<16x1xf32> -> vector<16x1xf32>
    %33 = vector.broadcast %32 : vector<16x1xf32> to vector<16x16xf32>
    %34 = arith.mulf %29, %33 : vector<16x16xf32>
    %cst_18 = arith.constant dense<0.000000e+00> : vector<16x32xf32>
    %35 = tpu.matmul %34, %23, %cst_18 {dimension_numbers = #tpu.dot_dimension_numbers<[1], [0], [0], [1], [0, 0, 1, 1], [], []>} : vector<16x16xf32>, vector<16x32xf32>, vector<16x32xf32> -> vector<16x32xf32>
    %c0_19 = arith.constant 0 : index
    %c0_20 = arith.constant 0 : index
    %c64 = arith.constant 64 : index
    %36 = vector.load %arg1[%c0_19, %c0_20, %c64] : memref<1x16x384xf32, #tpu.memory_space<vmem>>, vector<1x16x32xf32>
    %37 = vector.shape_cast %36 : vector<1x16x32xf32> to vector<16x32xf32>
    %c0_21 = arith.constant 0 : index
    %c0_22 = arith.constant 0 : index
    %c192 = arith.constant 192 : index
    %38 = vector.load %arg1[%c0_21, %c0_22, %c192] : memref<1x16x384xf32, #tpu.memory_space<vmem>>, vector<1x16x32xf32>
    %39 = vector.shape_cast %38 : vector<1x16x32xf32> to vector<16x32xf32>
    %c0_23 = arith.constant 0 : index
    %c0_24 = arith.constant 0 : index
    %c320 = arith.constant 320 : index
    %40 = vector.load %arg1[%c0_23, %c0_24, %c320] : memref<1x16x384xf32, #tpu.memory_space<vmem>>, vector<1x16x32xf32>
    %41 = vector.shape_cast %40 : vector<1x16x32xf32> to vector<16x32xf32>
    %cst_25 = arith.constant dense<0.000000e+00> : vector<16x16xf32>
    %42 = tpu.matmul %37, %39, %cst_25 {dimension_numbers = #tpu.dot_dimension_numbers<[1], [1], [0], [0], [0, 0, 1, 0], [], []>} : vector<16x32xf32>, vector<16x32xf32>, vector<16x16xf32> -> vector<16x16xf32>
    %cst_26 = arith.constant dense<0xFF800000> : vector<16xf32>
    %43 = vector.multi_reduction <maximumf>, %42, %cst_26 [1] : vector<16x16xf32> to vector<16xf32>
    %44 = vector.shape_cast %43 : vector<16xf32> to vector<16x1xf32>
    %45 = vector.broadcast %44 : vector<16x1xf32> to vector<16x16xf32>
    %46 = arith.subf %42, %45 : vector<16x16xf32>
    %47 = math.exp %46 : vector<16x16xf32>
    %cst_27 = arith.constant dense<0.000000e+00> : vector<16xf32>
    %48 = vector.multi_reduction <add>, %47, %cst_27 [1] : vector<16x16xf32> to vector<16xf32>
    %49 = vector.shape_cast %48 : vector<16xf32> to vector<16x1xf32>
    %50 = tpu.reciprocal %49 {approx = true} : vector<16x1xf32> -> vector<16x1xf32>
    %51 = vector.broadcast %50 : vector<16x1xf32> to vector<16x16xf32>
    %52 = arith.mulf %47, %51 : vector<16x16xf32>
    %cst_28 = arith.constant dense<0.000000e+00> : vector<16x32xf32>
    %53 = tpu.matmul %52, %41, %cst_28 {dimension_numbers = #tpu.dot_dimension_numbers<[1], [0], [0], [1], [0, 0, 1, 1], [], []>} : vector<16x16xf32>, vector<16x32xf32>, vector<16x32xf32> -> vector<16x32xf32>
    %c0_29 = arith.constant 0 : index
    %c0_30 = arith.constant 0 : index
    %c96 = arith.constant 96 : index
    %54 = vector.load %arg1[%c0_29, %c0_30, %c96] : memref<1x16x384xf32, #tpu.memory_space<vmem>>, vector<1x16x32xf32>
    %55 = vector.shape_cast %54 : vector<1x16x32xf32> to vector<16x32xf32>
    %c0_31 = arith.constant 0 : index
    %c0_32 = arith.constant 0 : index
    %c224 = arith.constant 224 : index
    %56 = vector.load %arg1[%c0_31, %c0_32, %c224] : memref<1x16x384xf32, #tpu.memory_space<vmem>>, vector<1x16x32xf32>
    %57 = vector.shape_cast %56 : vector<1x16x32xf32> to vector<16x32xf32>
    %c0_33 = arith.constant 0 : index
    %c0_34 = arith.constant 0 : index
    %c352 = arith.constant 352 : index
    %58 = vector.load %arg1[%c0_33, %c0_34, %c352] : memref<1x16x384xf32, #tpu.memory_space<vmem>>, vector<1x16x32xf32>
    %59 = vector.shape_cast %58 : vector<1x16x32xf32> to vector<16x32xf32>
    %cst_35 = arith.constant dense<0.000000e+00> : vector<16x16xf32>
    %60 = tpu.matmul %55, %57, %cst_35 {dimension_numbers = #tpu.dot_dimension_numbers<[1], [1], [0], [0], [0, 0, 1, 0], [], []>} : vector<16x32xf32>, vector<16x32xf32>, vector<16x16xf32> -> vector<16x16xf32>
    %cst_36 = arith.constant dense<0xFF800000> : vector<16xf32>
    %61 = vector.multi_reduction <maximumf>, %60, %cst_36 [1] : vector<16x16xf32> to vector<16xf32>
    %62 = vector.shape_cast %61 : vector<16xf32> to vector<16x1xf32>
    %63 = vector.broadcast %62 : vector<16x1xf32> to vector<16x16xf32>
    %64 = arith.subf %60, %63 : vector<16x16xf32>
    %65 = math.exp %64 : vector<16x16xf32>
    %cst_37 = arith.constant dense<0.000000e+00> : vector<16xf32>
    %66 = vector.multi_reduction <add>, %65, %cst_37 [1] : vector<16x16xf32> to vector<16xf32>
    %67 = vector.shape_cast %66 : vector<16xf32> to vector<16x1xf32>
    %68 = tpu.reciprocal %67 {approx = true} : vector<16x1xf32> -> vector<16x1xf32>
    %69 = vector.broadcast %68 : vector<16x1xf32> to vector<16x16xf32>
    %70 = arith.mulf %65, %69 : vector<16x16xf32>
    %cst_38 = arith.constant dense<0.000000e+00> : vector<16x32xf32>
    %71 = tpu.matmul %70, %59, %cst_38 {dimension_numbers = #tpu.dot_dimension_numbers<[1], [0], [0], [1], [0, 0, 1, 1], [], []>} : vector<16x16xf32>, vector<16x32xf32>, vector<16x32xf32> -> vector<16x32xf32>
    %72 = tpu.concatenate %17, %35, %53, %71 in 1 : vector<16x32xf32>, vector<16x32xf32>, vector<16x32xf32>, vector<16x32xf32> -> vector<16x128xf32>
    %c0_39 = arith.constant 0 : index
    %c0_40 = arith.constant 0 : index
    %c0_41 = arith.constant 0 : index
    %73 = vector.load %arg2[%c0_39, %c0_40, %c0_41] : memref<1x16x128xf32, #tpu.memory_space<vmem>>, vector<1x16x128xf32>
    %74 = vector.shape_cast %73 : vector<1x16x128xf32> to vector<16x128xf32>
    %75 = vector.shape_cast %72 : vector<16x128xf32> to vector<1x16x128xf32>
    tpu.vector_store %arg2[%c0_39, %c0_40, %c0_41], %75 {strides = array<i32>} : memref<1x16x128xf32, #tpu.memory_space<vmem>>, vector<1x16x128xf32>,
    return
  }
  func.func @transform_0(%arg0: i32) -> (i32, i32, i32) {
    %c0_i32 = arith.constant 0 : i32
    %c0_i32_0 = arith.constant 0 : i32
    %c0_i32_1 = arith.constant 0 : i32
    return %arg0, %c0_i32, %c0_i32_0 : i32, i32, i32
  }
  func.func @transform_1(%arg0: i32) -> (i32, i32, i32) {
    %c0_i32 = arith.constant 0 : i32
    %c0_i32_0 = arith.constant 0 : i32
    %c0_i32_1 = arith.constant 0 : i32
    return %arg0, %c0_i32, %c0_i32_0 : i32, i32, i32
  }
}

module attributes {stable_mosaic.version = 11 : i64} {
  func.func @_ffn_res_ln_kernel(%arg0: i32, %arg1: i32, %arg2: memref<32x128xf32, #tpu.memory_space<vmem>>, %arg3: memref<128x256xf32, #tpu.memory_space<vmem>>, %arg4: memref<1x256xf32, #tpu.memory_space<vmem>>, %arg5: memref<256x128xf32, #tpu.memory_space<vmem>>, %arg6: memref<1x128xf32, #tpu.memory_space<vmem>>, %arg7: memref<1x128xf32, #tpu.memory_space<vmem>>, %arg8: memref<1x128xf32, #tpu.memory_space<vmem>>, %arg9: memref<32x128xf32, #tpu.memory_space<vmem>>, %arg10: memref<32x128xf32, #tpu.memory_space<vmem>>) attributes {dimension_semantics = [#tpu.dimension_semantics<parallel>, #tpu.dimension_semantics<arbitrary>], iteration_bounds = array<i64: 1, 1>, scalar_prefetch = 0 : i64, scratch_operands = 1 : i64, tpu.core_type = #tpu.core_type<tc>, window_params = [{transform_indices = @transform_0, window_bounds = array<i64: 32, 128>}, {transform_indices = @transform_1, window_bounds = array<i64: 128, 256>}, {transform_indices = @transform_2, window_bounds = array<i64: 1, 256>}, {transform_indices = @transform_3, window_bounds = array<i64: 256, 128>}, {pipeline_mode = #tpu.pipeline_mode<synchronous>, transform_indices = @transform_4, window_bounds = array<i64: 1, 128>}, {pipeline_mode = #tpu.pipeline_mode<synchronous>, transform_indices = @transform_5, window_bounds = array<i64: 1, 128>}, {pipeline_mode = #tpu.pipeline_mode<synchronous>, transform_indices = @transform_6, window_bounds = array<i64: 1, 128>}, {transform_indices = @transform_7, window_bounds = array<i64: 32, 128>}]} {
    %c0_i32 = arith.constant 0 : i32
    %0 = arith.cmpi eq, %arg1, %c0_i32 : i32
    %1 = arith.extui %0 : i1 to i32
    %c0_i32_0 = arith.constant 0 : i32
    %2 = arith.cmpi ne, %1, %c0_i32_0 : i32
    scf.if %2 {
      %cst_16 = arith.constant 0.000000e+00 : f32
      %19 = vector.broadcast %cst_16 : f32 to vector<32x128xf32>
      %c0_17 = arith.constant 0 : index
      %c0_18 = arith.constant 0 : index
      %20 = vector.load %arg10[%c0_17, %c0_18] : memref<32x128xf32, #tpu.memory_space<vmem>>, vector<32x128xf32>
      tpu.vector_store %arg10[%c0_17, %c0_18], %19 {strides = array<i32>} : memref<32x128xf32, #tpu.memory_space<vmem>>, vector<32x128xf32>,
    } else {
    }
    %c0 = arith.constant 0 : index
    %c0_1 = arith.constant 0 : index
    %3 = vector.load %arg2[%c0, %c0_1] : memref<32x128xf32, #tpu.memory_space<vmem>>, vector<32x128xf32>
    %c0_2 = arith.constant 0 : index
    %c0_3 = arith.constant 0 : index
    %4 = vector.load %arg3[%c0_2, %c0_3] : memref<128x256xf32, #tpu.memory_space<vmem>>, vector<128x256xf32>
    %cst = arith.constant dense<0.000000e+00> : vector<32x256xf32>
    %5 = tpu.matmul %3, %4, %cst {dimension_numbers = #tpu.dot_dimension_numbers<[1], [0], [0], [1], [0, 0, 1, 1], [], []>} : vector<32x128xf32>, vector<128x256xf32>, vector<32x256xf32> -> vector<32x256xf32>
    %c0_4 = arith.constant 0 : index
    %c0_5 = arith.constant 0 : index
    %6 = vector.load %arg4[%c0_4, %c0_5] : memref<1x256xf32, #tpu.memory_space<vmem>>, vector<1x256xf32>
    %7 = vector.broadcast %6 : vector<1x256xf32> to vector<32x256xf32>
    %8 = arith.addf %5, %7 : vector<32x256xf32>
    %cst_6 = arith.constant 0.000000e+00 : f32
    %9 = vector.broadcast %cst_6 : f32 to vector<32x256xf32>
    %10 = arith.maximumf %8, %9 : vector<32x256xf32>
    %c0_7 = arith.constant 0 : index
    %c0_8 = arith.constant 0 : index
    %11 = vector.load %arg10[%c0_7, %c0_8] : memref<32x128xf32, #tpu.memory_space<vmem>>, vector<32x128xf32>
    %c0_9 = arith.constant 0 : index
    %c0_10 = arith.constant 0 : index
    %12 = vector.load %arg5[%c0_9, %c0_10] : memref<256x128xf32, #tpu.memory_space<vmem>>, vector<256x128xf32>
    %cst_11 = arith.constant dense<0.000000e+00> : vector<32x128xf32>
    %13 = tpu.matmul %10, %12, %cst_11 {dimension_numbers = #tpu.dot_dimension_numbers<[1], [0], [0], [1], [0, 0, 1, 1], [], []>} : vector<32x256xf32>, vector<256x128xf32>, vector<32x128xf32> -> vector<32x128xf32>
    %14 = arith.addf %11, %13 : vector<32x128xf32>
    %c0_12 = arith.constant 0 : index
    %c0_13 = arith.constant 0 : index
    %15 = vector.load %arg10[%c0_12, %c0_13] : memref<32x128xf32, #tpu.memory_space<vmem>>, vector<32x128xf32>
    tpu.vector_store %arg10[%c0_12, %c0_13], %14 {strides = array<i32>} : memref<32x128xf32, #tpu.memory_space<vmem>>, vector<32x128xf32>,
    %c0_i32_14 = arith.constant 0 : i32
    %16 = arith.cmpi eq, %arg1, %c0_i32_14 : i32
    %17 = arith.extui %16 : i1 to i32
    %c0_i32_15 = arith.constant 0 : i32
    %18 = arith.cmpi ne, %17, %c0_i32_15 : i32
    scf.if %18 {
      %c0_16 = arith.constant 0 : index
      %c0_17 = arith.constant 0 : index
      %19 = vector.load %arg10[%c0_16, %c0_17] : memref<32x128xf32, #tpu.memory_space<vmem>>, vector<32x128xf32>
      %c0_18 = arith.constant 0 : index
      %c0_19 = arith.constant 0 : index
      %20 = vector.load %arg6[%c0_18, %c0_19] : memref<1x128xf32, #tpu.memory_space<vmem>>, vector<1x128xf32>
      %21 = vector.broadcast %20 : vector<1x128xf32> to vector<32x128xf32>
      %22 = arith.addf %19, %21 : vector<32x128xf32>
      %c0_20 = arith.constant 0 : index
      %c0_21 = arith.constant 0 : index
      %23 = vector.load %arg2[%c0_20, %c0_21] : memref<32x128xf32, #tpu.memory_space<vmem>>, vector<32x128xf32>
      %24 = arith.addf %22, %23 : vector<32x128xf32>
      %cst_22 = arith.constant dense<0.000000e+00> : vector<32xf32>
      %25 = vector.multi_reduction <add>, %24, %cst_22 [1] : vector<32x128xf32> to vector<32xf32>
      %26 = vector.shape_cast %25 : vector<32xf32> to vector<32x1xf32>
      %cst_23 = arith.constant 1.280000e+02 : f32
      %27 = vector.broadcast %cst_23 : f32 to vector<32x1xf32>
      %28 = arith.divf %26, %27 : vector<32x1xf32>
      %29 = vector.broadcast %28 : vector<32x1xf32> to vector<32x128xf32>
      %30 = arith.subf %24, %29 : vector<32x128xf32>
      %31 = arith.mulf %30, %30 : vector<32x128xf32>
      %cst_24 = arith.constant dense<0.000000e+00> : vector<32xf32>
      %32 = vector.multi_reduction <add>, %31, %cst_24 [1] : vector<32x128xf32> to vector<32xf32>
      %33 = vector.shape_cast %32 : vector<32xf32> to vector<32x1xf32>
      %cst_25 = arith.constant 1.280000e+02 : f32
      %34 = vector.broadcast %cst_25 : f32 to vector<32x1xf32>
      %35 = arith.divf %33, %34 : vector<32x1xf32>
      %36 = vector.broadcast %28 : vector<32x1xf32> to vector<32x128xf32>
      %37 = arith.subf %24, %36 : vector<32x128xf32>
      %cst_26 = arith.constant 9.99999974E-6 : f32
      %38 = vector.broadcast %cst_26 : f32 to vector<32x1xf32>
      %39 = arith.addf %35, %38 : vector<32x1xf32>
      %40 = math.rsqrt %39 : vector<32x1xf32>
      %41 = vector.broadcast %40 : vector<32x1xf32> to vector<32x128xf32>
      %42 = arith.mulf %37, %41 : vector<32x128xf32>
      %c0_27 = arith.constant 0 : index
      %c0_28 = arith.constant 0 : index
      %43 = vector.load %arg7[%c0_27, %c0_28] : memref<1x128xf32, #tpu.memory_space<vmem>>, vector<1x128xf32>
      %44 = vector.broadcast %43 : vector<1x128xf32> to vector<32x128xf32>
      %45 = arith.mulf %42, %44 : vector<32x128xf32>
      %c0_29 = arith.constant 0 : index
      %c0_30 = arith.constant 0 : index
      %46 = vector.load %arg8[%c0_29, %c0_30] : memref<1x128xf32, #tpu.memory_space<vmem>>, vector<1x128xf32>
      %47 = vector.broadcast %46 : vector<1x128xf32> to vector<32x128xf32>
      %48 = arith.addf %45, %47 : vector<32x128xf32>
      %c0_31 = arith.constant 0 : index
      %c0_32 = arith.constant 0 : index
      %49 = vector.load %arg9[%c0_31, %c0_32] : memref<32x128xf32, #tpu.memory_space<vmem>>, vector<32x128xf32>
      tpu.vector_store %arg9[%c0_31, %c0_32], %48 {strides = array<i32>} : memref<32x128xf32, #tpu.memory_space<vmem>>, vector<32x128xf32>,
    } else {
    }
    return
  }
  func.func @transform_0(%arg0: i32, %arg1: i32) -> (i32, i32) {
    %c0_i32 = arith.constant 0 : i32
    %c0_i32_0 = arith.constant 0 : i32
    return %arg0, %c0_i32 : i32, i32
  }
  func.func @transform_1(%arg0: i32, %arg1: i32) -> (i32, i32) {
    %c0_i32 = arith.constant 0 : i32
    %c0_i32_0 = arith.constant 0 : i32
    return %c0_i32, %arg1 : i32, i32
  }
  func.func @transform_2(%arg0: i32, %arg1: i32) -> (i32, i32) {
    %c0_i32 = arith.constant 0 : i32
    %c0_i32_0 = arith.constant 0 : i32
    return %c0_i32, %arg1 : i32, i32
  }
  func.func @transform_3(%arg0: i32, %arg1: i32) -> (i32, i32) {
    %c0_i32 = arith.constant 0 : i32
    %c0_i32_0 = arith.constant 0 : i32
    return %arg1, %c0_i32 : i32, i32
  }
  func.func @transform_4(%arg0: i32, %arg1: i32) -> (i32, i32) {
    %c0_i32 = arith.constant 0 : i32
    %c0_i32_0 = arith.constant 0 : i32
    %c0_i32_1 = arith.constant 0 : i32
    return %c0_i32, %c0_i32_0 : i32, i32
  }
  func.func @transform_5(%arg0: i32, %arg1: i32) -> (i32, i32) {
    %c0_i32 = arith.constant 0 : i32
    %c0_i32_0 = arith.constant 0 : i32
    %c0_i32_1 = arith.constant 0 : i32
    return %c0_i32, %c0_i32_0 : i32, i32
  }
  func.func @transform_6(%arg0: i32, %arg1: i32) -> (i32, i32) {
    %c0_i32 = arith.constant 0 : i32
    %c0_i32_0 = arith.constant 0 : i32
    %c0_i32_1 = arith.constant 0 : i32
    return %c0_i32, %c0_i32_0 : i32, i32
  }
  func.func @transform_7(%arg0: i32, %arg1: i32) -> (i32, i32) {
    %c0_i32 = arith.constant 0 : i32
    %c0_i32_0 = arith.constant 0 : i32
    return %arg0, %c0_i32 : i32, i32
  }
}

module attributes {stable_mosaic.version = 11 : i64} {
  func.func @_linear_res_ln_kernel(%arg0: i32, %arg1: i32, %arg2: memref<32x128xf32, #tpu.memory_space<vmem>>, %arg3: memref<128x128xf32, #tpu.memory_space<vmem>>, %arg4: memref<1x128xf32, #tpu.memory_space<vmem>>, %arg5: memref<32x128xf32, #tpu.memory_space<vmem>>, %arg6: memref<1x128xf32, #tpu.memory_space<vmem>>, %arg7: memref<1x128xf32, #tpu.memory_space<vmem>>, %arg8: memref<32x128xf32, #tpu.memory_space<vmem>>, %arg9: memref<32x128xf32, #tpu.memory_space<vmem>>) attributes {dimension_semantics = [#tpu.dimension_semantics<parallel>, #tpu.dimension_semantics<arbitrary>], iteration_bounds = array<i64: 1, 1>, scalar_prefetch = 0 : i64, scratch_operands = 1 : i64, tpu.core_type = #tpu.core_type<tc>, window_params = [{transform_indices = @transform_0, window_bounds = array<i64: 32, 128>}, {transform_indices = @transform_1, window_bounds = array<i64: 128, 128>}, {pipeline_mode = #tpu.pipeline_mode<synchronous>, transform_indices = @transform_2, window_bounds = array<i64: 1, 128>}, {transform_indices = @transform_3, window_bounds = array<i64: 32, 128>}, {pipeline_mode = #tpu.pipeline_mode<synchronous>, transform_indices = @transform_4, window_bounds = array<i64: 1, 128>}, {pipeline_mode = #tpu.pipeline_mode<synchronous>, transform_indices = @transform_5, window_bounds = array<i64: 1, 128>}, {transform_indices = @transform_6, window_bounds = array<i64: 32, 128>}]} {
    %c0_i32 = arith.constant 0 : i32
    %0 = arith.cmpi eq, %arg1, %c0_i32 : i32
    %1 = arith.extui %0 : i1 to i32
    %c0_i32_0 = arith.constant 0 : i32
    %2 = arith.cmpi ne, %1, %c0_i32_0 : i32
    scf.if %2 {
      %cst_10 = arith.constant 0.000000e+00 : f32
      %12 = vector.broadcast %cst_10 : f32 to vector<32x128xf32>
      %c0_11 = arith.constant 0 : index
      %c0_12 = arith.constant 0 : index
      %13 = vector.load %arg9[%c0_11, %c0_12] : memref<32x128xf32, #tpu.memory_space<vmem>>, vector<32x128xf32>
      tpu.vector_store %arg9[%c0_11, %c0_12], %12 {strides = array<i32>} : memref<32x128xf32, #tpu.memory_space<vmem>>, vector<32x128xf32>,
    } else {
    }
    %c0 = arith.constant 0 : index
    %c0_1 = arith.constant 0 : index
    %3 = vector.load %arg9[%c0, %c0_1] : memref<32x128xf32, #tpu.memory_space<vmem>>, vector<32x128xf32>
    %c0_2 = arith.constant 0 : index
    %c0_3 = arith.constant 0 : index
    %4 = vector.load %arg2[%c0_2, %c0_3] : memref<32x128xf32, #tpu.memory_space<vmem>>, vector<32x128xf32>
    %c0_4 = arith.constant 0 : index
    %c0_5 = arith.constant 0 : index
    %5 = vector.load %arg3[%c0_4, %c0_5] : memref<128x128xf32, #tpu.memory_space<vmem>>, vector<128x128xf32>
    %cst = arith.constant dense<0.000000e+00> : vector<32x128xf32>
    %6 = tpu.matmul %4, %5, %cst {dimension_numbers = #tpu.dot_dimension_numbers<[1], [0], [0], [1], [0, 0, 1, 1], [], []>} : vector<32x128xf32>, vector<128x128xf32>, vector<32x128xf32> -> vector<32x128xf32>
    %7 = arith.addf %3, %6 : vector<32x128xf32>
    %c0_6 = arith.constant 0 : index
    %c0_7 = arith.constant 0 : index
    %8 = vector.load %arg9[%c0_6, %c0_7] : memref<32x128xf32, #tpu.memory_space<vmem>>, vector<32x128xf32>
    tpu.vector_store %arg9[%c0_6, %c0_7], %7 {strides = array<i32>} : memref<32x128xf32, #tpu.memory_space<vmem>>, vector<32x128xf32>,
    %c0_i32_8 = arith.constant 0 : i32
    %9 = arith.cmpi eq, %arg1, %c0_i32_8 : i32
    %10 = arith.extui %9 : i1 to i32
    %c0_i32_9 = arith.constant 0 : i32
    %11 = arith.cmpi ne, %10, %c0_i32_9 : i32
    scf.if %11 {
      %c0_10 = arith.constant 0 : index
      %c0_11 = arith.constant 0 : index
      %12 = vector.load %arg9[%c0_10, %c0_11] : memref<32x128xf32, #tpu.memory_space<vmem>>, vector<32x128xf32>
      %c0_12 = arith.constant 0 : index
      %c0_13 = arith.constant 0 : index
      %13 = vector.load %arg4[%c0_12, %c0_13] : memref<1x128xf32, #tpu.memory_space<vmem>>, vector<1x128xf32>
      %14 = vector.broadcast %13 : vector<1x128xf32> to vector<32x128xf32>
      %15 = arith.addf %12, %14 : vector<32x128xf32>
      %c0_14 = arith.constant 0 : index
      %c0_15 = arith.constant 0 : index
      %16 = vector.load %arg5[%c0_14, %c0_15] : memref<32x128xf32, #tpu.memory_space<vmem>>, vector<32x128xf32>
      %17 = arith.addf %15, %16 : vector<32x128xf32>
      %cst_16 = arith.constant dense<0.000000e+00> : vector<32xf32>
      %18 = vector.multi_reduction <add>, %17, %cst_16 [1] : vector<32x128xf32> to vector<32xf32>
      %19 = vector.shape_cast %18 : vector<32xf32> to vector<32x1xf32>
      %cst_17 = arith.constant 1.280000e+02 : f32
      %20 = vector.broadcast %cst_17 : f32 to vector<32x1xf32>
      %21 = arith.divf %19, %20 : vector<32x1xf32>
      %22 = vector.broadcast %21 : vector<32x1xf32> to vector<32x128xf32>
      %23 = arith.subf %17, %22 : vector<32x128xf32>
      %24 = arith.mulf %23, %23 : vector<32x128xf32>
      %cst_18 = arith.constant dense<0.000000e+00> : vector<32xf32>
      %25 = vector.multi_reduction <add>, %24, %cst_18 [1] : vector<32x128xf32> to vector<32xf32>
      %26 = vector.shape_cast %25 : vector<32xf32> to vector<32x1xf32>
      %cst_19 = arith.constant 1.280000e+02 : f32
      %27 = vector.broadcast %cst_19 : f32 to vector<32x1xf32>
      %28 = arith.divf %26, %27 : vector<32x1xf32>
      %29 = vector.broadcast %21 : vector<32x1xf32> to vector<32x128xf32>
      %30 = arith.subf %17, %29 : vector<32x128xf32>
      %cst_20 = arith.constant 9.99999974E-6 : f32
      %31 = vector.broadcast %cst_20 : f32 to vector<32x1xf32>
      %32 = arith.addf %28, %31 : vector<32x1xf32>
      %33 = math.rsqrt %32 : vector<32x1xf32>
      %34 = vector.broadcast %33 : vector<32x1xf32> to vector<32x128xf32>
      %35 = arith.mulf %30, %34 : vector<32x128xf32>
      %c0_21 = arith.constant 0 : index
      %c0_22 = arith.constant 0 : index
      %36 = vector.load %arg6[%c0_21, %c0_22] : memref<1x128xf32, #tpu.memory_space<vmem>>, vector<1x128xf32>
      %37 = vector.broadcast %36 : vector<1x128xf32> to vector<32x128xf32>
      %38 = arith.mulf %35, %37 : vector<32x128xf32>
      %c0_23 = arith.constant 0 : index
      %c0_24 = arith.constant 0 : index
      %39 = vector.load %arg7[%c0_23, %c0_24] : memref<1x128xf32, #tpu.memory_space<vmem>>, vector<1x128xf32>
      %40 = vector.broadcast %39 : vector<1x128xf32> to vector<32x128xf32>
      %41 = arith.addf %38, %40 : vector<32x128xf32>
      %c0_25 = arith.constant 0 : index
      %c0_26 = arith.constant 0 : index
      %42 = vector.load %arg8[%c0_25, %c0_26] : memref<32x128xf32, #tpu.memory_space<vmem>>, vector<32x128xf32>
      tpu.vector_store %arg8[%c0_25, %c0_26], %41 {strides = array<i32>} : memref<32x128xf32, #tpu.memory_space<vmem>>, vector<32x128xf32>,
    } else {
    }
    return
  }
  func.func @transform_0(%arg0: i32, %arg1: i32) -> (i32, i32) {
    %c0_i32 = arith.constant 0 : i32
    return %arg0, %arg1 : i32, i32
  }
  func.func @transform_1(%arg0: i32, %arg1: i32) -> (i32, i32) {
    %c0_i32 = arith.constant 0 : i32
    %c0_i32_0 = arith.constant 0 : i32
    return %arg1, %c0_i32 : i32, i32
  }
  func.func @transform_2(%arg0: i32, %arg1: i32) -> (i32, i32) {
    %c0_i32 = arith.constant 0 : i32
    %c0_i32_0 = arith.constant 0 : i32
    %c0_i32_1 = arith.constant 0 : i32
    return %c0_i32, %c0_i32_0 : i32, i32
  }
  func.func @transform_3(%arg0: i32, %arg1: i32) -> (i32, i32) {
    %c0_i32 = arith.constant 0 : i32
    %c0_i32_0 = arith.constant 0 : i32
    return %arg0, %c0_i32 : i32, i32
  }
  func.func @transform_4(%arg0: i32, %arg1: i32) -> (i32, i32) {
    %c0_i32 = arith.constant 0 : i32
    %c0_i32_0 = arith.constant 0 : i32
    %c0_i32_1 = arith.constant 0 : i32
    return %c0_i32, %c0_i32_0 : i32, i32
  }
  func.func @transform_5(%arg0: i32, %arg1: i32) -> (i32, i32) {
    %c0_i32 = arith.constant 0 : i32
    %c0_i32_0 = arith.constant 0 : i32
    %c0_i32_1 = arith.constant 0 : i32
    return %c0_i32, %c0_i32_0 : i32, i32
  }
  func.func @transform_6(%arg0: i32, %arg1: i32) -> (i32, i32) {
    %c0_i32 = arith.constant 0 : i32
    %c0_i32_0 = arith.constant 0 : i32
    return %arg0, %c0_i32 : i32, i32
  }
}

</mosaic_0001>

<bundles_post_ra>
// kernel: transformer_encoder_layer.4
= control target key start
LH: loop header
LB: loop body
LE: loop exit
PB: predicated region body
PF: predicated region fallthrough
CT: control target
= control target key end

     0   :  { %8 = vsyncpa [#allocation4], 0  ;;  %s517_s12 = smov [#allocation3]   ;;  %s608_s0 = inlined_call_operand.vmem [shape: f32[32,128], index: 0, kind: input, shape index: {}]   ;;  %s609_s1 = inlined_call_operand.hbm [shape: f32[128,384], index: 1, kind: input, shape index: {}]   ;;  %s610_s2 = inlined_call_operand.vmem [shape: f32[1,384], index: 2, kind: input, shape index: {}]   ;;  %s611_s3 = inlined_call_operand.vmem [shape: f32[32,384], index: 3, kind: output, shape index: {}]  }
   0x1   :  { %s16_s13 = sshll.u32 %s517_s12, 4  ;;  %s493_s16 = scalar_lea.hbm %s609_s1, 6144  ;;  %s17_s13 = int_to_ptr.vmem [resolvable:$true] %s16_s13 }
   0x2   :  { %p494_p0 = scmp.ne.s32.totalorder %s609_s1, %s493_s16  ;;  %p497_p1 = scmp.lt.u32.totalorder %s493_s16, %s609_s1 }
   0x4   :  { %p499_p2 = pnand %p497_p1, %p494_p0 }
   0x6   :  { %502 = shalt.err (!%p499_p2)
}
   0x7   :  { %s503_s21 = scalar_lea.vmem %s17_s13, 6144  ;;  %p508_p4 = scmp.lt.s32.totalorder %s17_s13, %s17_s13 }
   0x8   :  { %p504_p3 = scmp.ne.s32.totalorder %s17_s13, %s503_s21  ;;  %p509_p5 = scmp.lt.s32.totalorder %s503_s21, %s503_s21 }
   0xa   :  { %p510_p6 = por %p509_p5, %p508_p4 }
   0xc   :  { %p511_p7 = pnand %p510_p6, %p504_p3 }
   0xe   :  { %514 = shalt.err (!%p511_p7)
}
   0xf   :  { %s518_s22 = smov 384   ;;  %s519_s23 = smov 24  }
  0x10   :  { %22 = dma.hbm_to_vmem [thread:$0]  %s609_s1, 6144, %s17_s13, [#allocation4], %s518_s22, %s518_s22, %s519_s23  }
  0x11   :  { %515 = dma.done.wait [#allocation4], 6144  }
  0x12   :  { %516 = vsyncadd [#allocation4], 4294961152  ;;  %v520_v0 = vmov 0.0   ;;  %v61_v1 = vld [vmem:[#allocation3 + $0x8] sm:$0xff]  ;;  %v64_v2 = vld [vmem:[#allocation3 + $0x20] sm:$0xff] }
  0x13   :  { %172 = vmatprep.mubr.f32.mxu0 %v520_v0  ;;  %v60_v3 = vld [vmem:[#allocation3] sm:$0xff]  ;;  %v425_v4 = vpack.c.bf16 %v64_v2, %v61_v1  ;;  %v63_v5 = vld [vmem:[#allocation3 + $0x18] sm:$0xff]  ;;  %v70_v7 = vld [vmem:[#allocation3 + $0x50] sm:$0xff] }
  0x14   :  { %v67_v6 = vld [vmem:[#allocation3 + $0x38] sm:$0xff]  ;;  %v427_v8 = vpack.c.bf16 %v63_v5, %v60_v3  ;;  %v66_v10 = vld [vmem:[#allocation3 + $0x30] sm:$0xff]  ;;  %v69_v11 = vld [vmem:[#allocation3 + $0x48] sm:$0xff] }
  0x15   :  { %v429_v9 = vpack.c.bf16 %v70_v7, %v67_v6  ;;  %v62_v12 = vld [vmem:[#allocation3 + $0x10] sm:$0xff]  ;;  %426 = vmatprep.subr.bf16.mxu0 %v425_v4  ;;  %v65_v13 = vld [vmem:[#allocation3 + $0x28] sm:$0xff]  ;;  %v76_v15 = vld [vmem:[#allocation3 + $0x80] sm:$0xff]  ;;  %v431_v16 = vpack.c.bf16 %v69_v11, %v66_v10 }
  0x16   :  { %v73_v14 = vld [vmem:[#allocation3 + $0x68] sm:$0xff]  ;;  %428 = vmatpush1.bf16.msra.mxu0 %v427_v8  ;;  %v457_v17 = vpack.c.bf16 %v65_v13, %v62_v12  ;;  %v68_v18 = vld [vmem:[#allocation3 + $0x40] sm:$0xff]  ;;  %v75_v21 = vld [vmem:[#allocation3 + $0x78] sm:$0xff] }
  0x17   :  { %430 = vmatprep.subr.bf16.mxu0 %v429_v9  ;;  %v433_v19 = vpack.c.bf16 %v76_v15, %v73_v14  ;;  %v72_v20 = vld [vmem:[#allocation3 + $0x60] sm:$0xff]  ;;  %v71_v22 = vld [vmem:[#allocation3 + $0x58] sm:$0xff]  ;;  %v82_v25 = vld [vmem:[#allocation3 + $0xb0] sm:$0xff]  ;;  %v323_v14 = vlaneseq }
  0x18   :  { %458 = vmatprep.subr.bf16.mxu1 %v457_v17  ;;  %v461_v23 = vpack.c.bf16 %v71_v22, %v68_v18  ;;  %v79_v24 = vld [vmem:[#allocation3 + $0x98] sm:$0xff]  ;;  %v74_v26 = vld [vmem:[#allocation3 + $0x70] sm:$0xff]  ;;  %v77_v27 = vld [vmem:[#allocation3 + $0x88] sm:$0xff]  ;;  %v435_v28 = vpack.c.bf16 %v75_v21, %v72_v20 }
  0x19   :  { %460 = vmatpush3.bf16.msra.mxu1 %v457_v17  ;;  %v78_v29 = vld [vmem:[#allocation3 + $0x90] sm:$0xff]  ;;  %v465_v30 = vpack.c.bf16 %v77_v27, %v74_v26  ;;  %v437_v31 = vpack.c.bf16 %v82_v25, %v79_v24  ;;  %v81_v32 = vld [vmem:[#allocation3 + $0xa8] sm:$0xff]  ;;  %v80_v33 = vld [vmem:[#allocation3 + $0xa0] sm:$0xff]  ;;  %v324_v15 = vshrl.u32 %v323_v14, 7 }
  0x1a   :  { %432 = vmatpush1.bf16.msra.mxu0 %v431_v16  ;;  %462 = vmatprep.subr.bf16.mxu1 %v461_v23  ;;  %v83_v34 = vld [vmem:[#allocation3 + $0xb8] sm:$0xff]  ;;  %v85_v35 = vld [vmem:[#allocation3 + $0xc8] sm:$0xff]  ;;  %v88_v36 = vld [vmem:[#allocation3 + $0xe0] sm:$0xff]  ;;  %v439_v37 = vpack.c.bf16 %v81_v32, %v78_v29 }
  0x1b   :  { %434 = vmatprep.subr.bf16.mxu0 %v433_v19  ;;  %v84_v38 = vld [vmem:[#allocation3 + $0xc0] sm:$0xff]  ;;  %v469_v39 = vpack.c.bf16 %v83_v34, %v80_v33  ;;  %v441_v40 = vpack.c.bf16 %v88_v36, %v85_v35  ;;  %v87_v41 = vld [vmem:[#allocation3 + $0xd8] sm:$0xff]  ;;  %v86_v42 = vld [vmem:[#allocation3 + $0xd0] sm:$0xff]  ;;  %v325_v16 = vsub.s32 0, %v324_v15  ;;  %v329_v18 = vsub.s32 1, %v324_v15 }
  0x1c   :  { %v89_v43 = vld [vmem:[#allocation3 + $0xe8] sm:$0xff]  ;;  %v91_v44 = vld [vmem:[#allocation3 + $0xf8] sm:$0xff]  ;;  %v94_v45 = vld [vmem:[#allocation3 + $0x110] sm:$0xff]  ;;  %v443_v46 = vpack.c.bf16 %v87_v41, %v84_v38  ;;  %v333_v19 = vsub.s32 2, %v324_v15 }
  0x1d   :  { %464 = vmatpush3.bf16.msra.mxu1 %v461_v23  ;;  %v90_v47 = vld [vmem:[#allocation3 + $0xf0] sm:$0xff]  ;;  %v473_v48 = vpack.c.bf16 %v89_v43, %v86_v42  ;;  %v56_v49 = vld [vmem:[%s608_s0] sm:$0xff]  ;;  %v445_v50 = vpack.c.bf16 %v94_v45, %v91_v44  ;;  %v93_v51 = vld [vmem:[#allocation3 + $0x108] sm:$0xff] }
  0x1e   :  { %436 = vmatpush1.bf16.msra.mxu0 %v435_v28  ;;  %466 = vmatprep.subr.bf16.mxu1 %v465_v30  ;;  %v92_v52 = vld [vmem:[#allocation3 + $0x100] sm:$0xff]  ;;  %v95_v53 = vld [vmem:[#allocation3 + $0x118] sm:$0xff]  ;;  %v97_v54 = vld [vmem:[#allocation3 + $0x128] sm:$0xff]  ;;  %v447_v56 = vpack.c.bf16 %v93_v51, %v90_v47 }
  0x1f   :  { %438 = vmatprep.subr.bf16.mxu0 %v437_v31  ;;  %419 = vmatprep.mubr.f32.mxu1 %v56_v49  ;;  %v100_v55 = vld [vmem:[#allocation3 + $0x140] sm:$0xff]  ;;  %v477_v58 = vpack.c.bf16 %v95_v53, %v92_v52  ;;  %v99_v60 = vld [vmem:[#allocation3 + $0x138] sm:$0xff]  ;;  %v98_v61 = vld [vmem:[#allocation3 + $0x130] sm:$0xff] }
  0x20   :  { %v96_v57 = vld [vmem:[#allocation3 + $0x120] sm:$0xff]  ;;  %v449_v59 = vpack.c.bf16 %v100_v55, %v97_v54  ;;  %v101_v62 = vld [vmem:[#allocation3 + $0x148] sm:$0xff]  ;;  %v103_v63 = vld [vmem:[#allocation3 + $0x158] sm:$0xff] }
  0x21   :  { %468 = vmatpush3.bf16.msra.mxu1 %v465_v30  ;;  %v106_v1 = vld [vmem:[#allocation3 + $0x170] sm:$0xff]  ;;  %v451_v2 = vpack.c.bf16 %v99_v60, %v96_v57  ;;  %v481_v4 = vpack.c.bf16 %v101_v62, %v98_v61  ;;  %v105_v6 = vld [vmem:[#allocation3 + $0x168] sm:$0xff]  ;;  %v104_v7 = vld [vmem:[#allocation3 + $0x160] sm:$0xff] }
  0x22   :  { %440 = vmatpush1.bf16.msra.mxu0 %v439_v37  ;;  %470 = vmatprep.subr.bf16.mxu1 %v469_v39  ;;  %v102_v3 = vld [vmem:[#allocation3 + $0x150] sm:$0xff]  ;;  %v453_v5 = vpack.c.bf16 %v106_v1, %v103_v63  ;;  %v107_v8 = vld [vmem:[#allocation3 + $0x178] sm:$0xff]  ;;  %v57_v11 = vld [vmem:[%s608_s0 + $0x8] sm:$0xff] }
  0x23   :  { %442 = vmatprep.subr.bf16.mxu0 %v441_v40  ;;  %v455_v9 = vpack.c.bf16 %v105_v6, %v102_v3  ;;  %v485_v10 = vpack.c.bf16 %v107_v8, %v104_v7  ;;  %v58_v12 = vld [vmem:[%s608_s0 + $0x10] sm:$0xff]  ;;  %v59_v13 = vld [vmem:[%s608_s0 + $0x18] sm:$0xff]  ;;  %v321_v17 = vld [vmem:[%s610_s2] sm:$0x7] }
  0x24   :  { %v326_v20 = vrot.slane %v321_v17, %v325_v16  ;;  %v330_v21 = vrot.slane %v321_v17, %v329_v18  ;;  %v334_v23 = vrot.slane %v321_v17, %v333_v19 }
  0x25   :  { %472 = vmatpush3.bf16.msra.mxu1 %v469_v39 }
  0x26   :  { %444 = vmatpush1.bf16.msra.mxu0 %v443_v46  ;;  %474 = vmatprep.subr.bf16.mxu1 %v473_v48 }
  0x27   :  { %446 = vmatprep.subr.bf16.mxu0 %v445_v50 }
  0x29   :  { %476 = vmatpush3.bf16.msra.mxu1 %v473_v48 }
  0x2a   :  { %448 = vmatpush1.bf16.msra.mxu0 %v447_v56  ;;  %478 = vmatprep.subr.bf16.mxu1 %v477_v58 }
  0x2b   :  { %450 = vmatprep.subr.bf16.mxu0 %v449_v59 }
  0x2d   :  { %480 = vmatpush3.bf16.msra.mxu1 %v477_v58 }
  0x2e   :  { %452 = vmatpush1.bf16.msra.mxu0 %v451_v2  ;;  %482 = vmatprep.subr.bf16.mxu1 %v481_v4 }
  0x2f   :  { %454 = vmatprep.subr.bf16.mxu0 %v453_v5 }
  0x31   :  { %484 = vmatpush3.bf16.msra.mxu1 %v481_v4 }
  0x32   :  { %456 = vmatpush1.bf16.msra.mxu0 %v455_v9  ;;  %486 = vmatprep.subr.bf16.mxu1 %v485_v10 }
  0x35   :  { %173 = vmatmul.mubr.f32.vlgmr.msra.gmra.mrb[0].mxu0 %v56_v49  ;;  %488 = vmatpush3.bf16.msra.mxu1 %v485_v10 }
  0x36   :  { %178 = vmatprep.mubr.f32.mxu0 %v520_v0 }
  0x38   :  { %420 = vmatmul.mubr.f32.vlgmr.msra.gmra.mrb[0].mxu1 %v57_v11 }
  0x39   :  { %179 = vmatmul.mubr.f32.gmra.mrb[2].mxu0 %v57_v11  ;;  %422 = vmatprep.mubr.f32.mxu1 %v58_v12 }
  0x3a   :  { %184 = vmatprep.mubr.f32.mxu0 %v520_v0 }
  0x3c   :  { %423 = vmatmul.mubr.f32.gmra.mrb[2].mxu1 %v59_v13 }
  0x3d   :  { %185 = vmatmul.mubr.f32.gmra.mrb[4].mxu0 %v58_v12 }
  0x3e   :  { %190 = vmatprep.mubr.f32.mxu0 %v520_v0 }
  0x41   :  { %191 = vmatmul.mubr.f32.gmra.mrb[6].mxu0 %v59_v13 }
 0x108   :  { %v174_v22 = vpop.f32.mrb[0].mxu0 }
 0x109   :  { %v338_v24 = vadd.f32 %v326_v20, %v174_v22  ;;  %v176_v25 = vpop.f32.mrb[1].mxu0 }
 0x10a   :  { %v339_v26 = vadd.f32 %v330_v21, %v176_v25 }
 0x10b   :  { %350 = vst [vmem:[%s611_s3] sm:$0xff] %v338_v24  ;;  %v421_v0 = vpop.f32.mrb[0].mxu1 }
 0x10c   :  { %351 = vst [vmem:[%s611_s3 + $0x8] sm:$0xff] %v339_v26  ;;  %v180_v27 = vpop.f32.mrb[2].mxu0  ;;  %v343_v28 = vadd.f32 %v421_v0, %v334_v23  ;;  %v263_v29 = vpop.f32.mrb[1].mxu1 }
 0x10d   :  { %v341_v30 = vadd.f32 %v326_v20, %v180_v27  ;;  %v182_v31 = vpop.f32.mrb[3].mxu0  ;;  %v340_v32 = vadd.f32 %v334_v23, %v263_v29 }
 0x10e   :  { %v342_v33 = vadd.f32 %v330_v21, %v182_v31  ;;  %355 = vst [vmem:[%s611_s3 + $0x28] sm:$0xff] %v343_v28 }
 0x10f   :  { %353 = vst [vmem:[%s611_s3 + $0x18] sm:$0xff] %v341_v30  ;;  %352 = vst [vmem:[%s611_s3 + $0x10] sm:$0xff] %v340_v32  ;;  %v424_v34 = vpop.f32.mrb[2].mxu1 }
 0x110   :  { %354 = vst [vmem:[%s611_s3 + $0x20] sm:$0xff] %v342_v33  ;;  %v186_v35 = vpop.f32.mrb[4].mxu0  ;;  %v349_v36 = vadd.f32 %v424_v34, %v334_v23  ;;  %v273_v37 = vpop.f32.mrb[3].mxu1 }
 0x111   :  { %v344_v38 = vadd.f32 %v326_v20, %v186_v35  ;;  %v188_v39 = vpop.f32.mrb[5].mxu0  ;;  %v346_v40 = vadd.f32 %v334_v23, %v273_v37 }
 0x112   :  { %v345_v41 = vadd.f32 %v330_v21, %v188_v39  ;;  %361 = vst [vmem:[%s611_s3 + $0x58] sm:$0xff] %v349_v36 }
 0x113   :  { %356 = vst [vmem:[%s611_s3 + $0x30] sm:$0xff] %v344_v38  ;;  %358 = vst [vmem:[%s611_s3 + $0x40] sm:$0xff] %v346_v40 }
 0x114   :  { %357 = vst [vmem:[%s611_s3 + $0x38] sm:$0xff] %v345_v41  ;;  %v192_v42 = vpop.f32.mrb[6].mxu0 }
 0x115   :  { %v347_v43 = vadd.f32 %v326_v20, %v192_v42  ;;  %v194_v44 = vpop.f32.mrb[7].mxu0 }
 0x116   :  { %v348_v45 = vadd.f32 %v330_v21, %v194_v44 }
 0x117   :  { %359 = vst [vmem:[%s611_s3 + $0x48] sm:$0xff] %v347_v43 }
 0x118   :  { %360 = vst [vmem:[%s611_s3 + $0x50] sm:$0xff] %v348_v45 }
 0x119   :  { %366 = vsyncpa [#allocation4], 1 }

// kernel: transformer_encoder_layer.5
= control target key start
LH: loop header
LB: loop body
LE: loop exit
PB: predicated region body
PF: predicated region fallthrough
CT: control target
= control target key end

     0   :  { %s1264_s6 = smov 0   ;;  %s1398_s0 = inlined_call_operand.vmem [shape: f32[2,16,384], index: 0, kind: input, shape index: {}]   ;;  %s1399_s1 = inlined_call_operand.vmem [shape: f32[2,16,128], index: 1, kind: output, shape index: {}]  }
   0x1 LB: > { %s1006_s7 = sadd.s32 4294967295, %s1249_s6   ;;  %p1010_p0 = scmp.ge.s32.totalorder %s1249_s6, 1  ;;  %s1249_s6 = sphi %s1264_s6, %s11_s6  }
   0x2   : > { %p87_p1 = scmp.lt.s32.totalorder %s1249_s6, 3 }
   0x4   : > { %p88_p2 = pnand %p1010_p0, %p87_p1 }
   0x5   : > { %p107_p3 = scmp.lt.s32.totalorder (!%p88_p2), %s1006_s7, 1  ;;  %vm123_vm0 = vcmask (!%p88_p2), 261120   ;;  %s1251_s12 = smov (!%p88_p2), 96   ;;  %vm211_vm2 = vcmask (!%p88_p2), 130048   ;;  %vm943_vm3 = vcmask (!%p88_p2), 523264   ;;  %vm946_vm4 = vcmask (!%p88_p2), 785408  }
   0x6   : > { %91 = sbr.rel (%p88_p2) target bundleno = 2511 (0x9cf), region = 24  ;;  %vm1282_vm1 = vmpackc.low (!%p88_p2), %vm123_vm0, %vm123_vm0  ;;  %s1252_s13 = smov (!%p88_p2), 64  }
   0x7   : > { %s1253_s14 = smov (!%p88_p2), 32  }
   0xd   : > { %s1403_s7 = smov (!%p107_p3, %s1006_s7), 1 }
   0xe   : > { %s1169_s8 = smul.u32 48, %s1403_s7  ;;  %s1040_s15 = sshll.u32 %s1403_s7, 4 }
   0xf   : > { %s116_s18 = scalar_lea.vmem %s1399_s1, %s1040_s15 }
  0x10   : > { %s1278_s11 = scalar_lea.vmem %s1398_s0, %s1169_s8 }
  0x11   : > { %v119_v1 = vld [vmem:[%s1278_s11 + $0x8] sm:$0xff]  ;;  %v120_v2 = vld [vmem:[%s1278_s11 + $0x20] sm:$0xff]  ;;  %v1298_v5 = vld [vmem:[%s1278_s11 + $0x18] sm:$0xff] }
  0x12   : > { %v1289_v3 = vld [vmem:[%s1278_s11] sm:$0xff]  ;;  %v1129_v4 = vpack.c.bf16 %v120_v2, %v119_v1  ;;  %v1306_v10 = vpack.i.bf16 %v120_v2, %v119_v1  ;;  %v121_v21 = vld [vmem:[%s1278_s11 + $0x10] sm:$0xff]  ;;  %v122_v22 = vld [vmem:[%s1278_s11 + $0x28] sm:$0xff] }
  0x13   : > { %1077 = vmatprep.mubr.msk.f32.mxu0 %vm123_vm0, %v1289_v3  ;;  %315 = vrot.lane.b32.xlu1 %v1289_v3, %s1251_s12  ;;  %v1135_v24 = vpack.c.bf16 %v122_v22, %v121_v21  ;;  %v1330_v42 = vpack.i.bf16 %v122_v22, %v121_v21 }
  0x14   : > { %1131 = vmatprep.subr.msk.bf16.mxu0 %vm1282_vm1, %v1129_v4 }
  0x15   : > { %1134 = vmatpush3.bf16.xpose.msk.msra.mxu0 %vm1282_vm1, %v1129_v4  ;;  %1136 = vmatprep.subr.bf16.mxu1 %v1135_v24 }
  0x16   : > { %1138 = vmatpush3.bf16.msra.mxu1 %v1135_v24 }
  0x1c   : > { %1078 = vmatmul.mubr.msk.f32.vlgmr.msra.gmra.mrb[0].mxu0 %vm123_vm0, %v1298_v5 }
  0x85   : > { %v316_v28 = vpop.permute.xlu1 %315 }
  0xef   : > { %v1079_v6 = vpop.f32.mrb[0].mxu0 }
  0xf0   : > { %v202_v7 = vpop.f32.mrb[1].mxu0  ;;  %v215_v9 = vsel %vm211_vm2, %v1079_v6, -inf }
  0xf1   : > { %v212_v8 = vsel %vm211_vm2, %v202_v7, -inf }
  0xf2   : > { %213 = vmax.xlane.f32.xlu0 %v212_v8 }
  0xf6   : > { %216 = vmax.xlane.f32.xlu0 %v215_v9 }
 0x10c   : > { %1182 = vrot.lane.b32.xlu0 %v1306_v10, %s1251_s12 }
 0x17f   : > { %v214_v11 = vpop.xlane.xlu0 %213 }
 0x180   : > { %v218_v12 = vsub.f32 %v202_v7, %v214_v11 }
 0x182   : > { %v220_v15 = vmul.f32 1.442695, %v218_v12 }
 0x183   : > { %v217_v13 = vpop.xlane.xlu0 %216 }
 0x184   : > { %v219_v14 = vsub.f32 %v1079_v6, %v217_v13 }
 0x186   : > { %v222_v16 = vmul.f32 1.442695, %v219_v14 }
 0x187   : > { %v1183_v23 = vpop.permute.xlu0 %1182 }
 0x188   : > { %1211 = vpow2.f32 %v222_v16  ;;  %v1185_v25 = vunpack.i.h.bf16 %v1183_v23  ;;  %v1184_v26 = vunpack.i.l.bf16 %v1183_v23 }
 0x189   : > { %1213 = vpow2.f32 %v220_v15 }
 0x18a   : > { %v1139_v27 = vpack.c.bf16 %v1185_v25, %v1184_v26 }
 0x18c   : > { %1141 = vmatprep.subr.msk.bf16.mxu1 %vm1282_vm1, %v1139_v27 }
 0x192   : > { %v1212_v17 = vpop.eup %1211 }
 0x193   : > { %v227_v18 = vsel %vm211_vm2, %v1212_v17, 0.0  ;;  %v1214_v19 = vpop.eup %1213 }
 0x194   : > { %228 = vadd.xlane.f32.xlu1 %v227_v18  ;;  %v224_v20 = vsel %vm211_vm2, %v1214_v19, 0.0 }
 0x198   : > { %225 = vadd.xlane.f32.xlu1 %v224_v20 }
 0x1a9   : > { %317 = vrot.lane.b32.xlu1 %v1298_v5, %s1251_s12 }
 0x221   : > { %v229_v29 = vpop.xlane.xlu1 %228 }
 0x222   : > { %1215 = vrcp.f32 %v229_v29 }
 0x225   : > { %v226_v30 = vpop.xlane.xlu1 %225 }
 0x226   : > { %1217 = vrcp.f32 %v226_v30 }
 0x229   : > { %v318_v35 = vpop.permute.xlu1 %317 }
 0x22c   : > { %v1216_v31 = vpop.eup %1215 }
 0x22d   : > { %v233_v34 = vmul.f32 %v1216_v31, %v1212_v17 }
 0x230   : > { %v1218_v32 = vpop.eup %1217 }
 0x231   : > { %v232_v33 = vmul.f32 %v1218_v32, %v1214_v19 }
 0x233   : > { %1084 = vmatprep.mubr.msk.f32.mxu1 %vm211_vm2, %v232_v33 }
 0x234   : > { %1085 = vmatmul.mubr.msk.f32.vlgmr.msra.gmra.mrb[0].mxu1 %vm211_vm2, %v233_v34 }
 0x235   : > { %1144 = vmatpush3.bf16.xpose.msk.msra.mxu1 %vm1282_vm1, %v1139_v27  ;;  %1091 = vmatprep.mubr.msk.f32.mxu1 %vm123_vm0, %v316_v28 }
 0x23c   : > { %1092 = vmatmul.mubr.msk.f32.vlgmr.msra.gmra.mrb[2].mxu1 %vm123_vm0, %v318_v35 }
 0x307   : > { %v1324_v36 = vpop.f32.mrb[0].mxu1 }
 0x308   : > { %v1326_v37 = vpop.f32.mrb[1].mxu1 }
 0x30f   : > { %v1093_v38 = vpop.f32.mrb[2].mxu1 }
 0x310   : > { %v397_v39 = vpop.f32.mrb[3].mxu1  ;;  %v409_v40 = vsel %vm211_vm2, %v1093_v38, -inf }
 0x311   : > { %410 = vmax.xlane.f32.xlu0 %v409_v40  ;;  %v406_v41 = vsel %vm211_vm2, %v397_v39, -inf }
 0x312   : > { %407 = vmax.xlane.f32.xlu1 %v406_v41 }
 0x323   : > { %1187 = vrot.lane.b32.xlu1 %v1330_v42, %s1251_s12 }
 0x327   : > { %517 = vrot.lane.b32.xlu1 %v1289_v3, %s1252_s13 }
 0x32b   : > { %519 = vrot.lane.b32.xlu1 %v1298_v5, %s1252_s13 }
 0x39e   : > { %v411_v43 = vpop.xlane.xlu0 %410 }
 0x39f   : > { %v413_v44 = vsub.f32 %v1093_v38, %v411_v43  ;;  %v408_v45 = vpop.xlane.xlu1 %407 }
 0x3a0   : > { %v412_v46 = vsub.f32 %v397_v39, %v408_v45 }
 0x3a1   : > { %v416_v47 = vmul.f32 1.442695, %v413_v44 }
 0x3a2   : > { %v414_v48 = vmul.f32 1.442695, %v412_v46 }
 0x3a3   : > { %1219 = vpow2.f32 %v416_v47  ;;  %v1188_v53 = vpop.permute.xlu1 %1187 }
 0x3a4   : > { %1221 = vpow2.f32 %v414_v48  ;;  %v1190_v54 = vunpack.i.h.bf16 %v1188_v53  ;;  %v1189_v55 = vunpack.i.l.bf16 %v1188_v53 }
 0x3a6   : > { %v1145_v56 = vpack.c.bf16 %v1190_v54, %v1189_v55 }
 0x3a7   : > { %v518_v6 = vpop.permute.xlu1 %517 }
 0x3a8   : > { %1146 = vmatprep.subr.bf16.mxu0 %v1145_v56 }
 0x3a9   : > { %1148 = vmatpush3.bf16.msra.mxu0 %v1145_v56 }
 0x3ab   : > { %v520_v7 = vpop.permute.xlu1 %519 }
 0x3ad   : > { %v1220_v49 = vpop.eup %1219 }
 0x3ae   : > { %v421_v50 = vsel %vm211_vm2, %v1220_v49, 0.0  ;;  %v1222_v51 = vpop.eup %1221 }
 0x3af   : > { %422 = vadd.xlane.f32.xlu0 %v421_v50  ;;  %v418_v52 = vsel %vm211_vm2, %v1222_v51, 0.0 }
 0x3b3   : > { %419 = vadd.xlane.f32.xlu0 %v418_v52 }
 0x3c9   : > { %1192 = vrot.lane.b32.xlu0 %v1306_v10, %s1252_s13 }
 0x43c   : > { %v423_v57 = vpop.xlane.xlu0 %422 }
 0x43d   : > { %1223 = vrcp.f32 %v423_v57 }
 0x440   : > { %v420_v58 = vpop.xlane.xlu0 %419 }
 0x441   : > { %1225 = vrcp.f32 %v420_v58 }
 0x444   : > { %v1193_v59 = vpop.permute.xlu0 %1192 }
 0x445   : > { %v1195_v60 = vunpack.i.h.bf16 %v1193_v59  ;;  %v1194_v61 = vunpack.i.l.bf16 %v1193_v59 }
 0x447   : > { %v1149_v62 = vpack.c.bf16 %v1195_v60, %v1194_v61  ;;  %v1224_v63 = vpop.eup %1223 }
 0x448   : > { %v427_v4 = vmul.f32 %v1224_v63, %v1220_v49 }
 0x449   : > { %1151 = vmatprep.subr.msk.bf16.mxu0 %vm1282_vm1, %v1149_v62 }
 0x44b   : > { %v1226_v1 = vpop.eup %1225 }
 0x44c   : > { %v426_v2 = vmul.f32 %v1226_v1, %v1222_v51 }
 0x44e   : > { %1098 = vmatprep.mubr.msk.f32.mxu0 %vm211_vm2, %v426_v2 }
 0x44f   : > { %1099 = vmatmul.mubr.msk.f32.vlgmr.msra.gmra.mrb[2].mxu0 %vm211_vm2, %v427_v4 }
 0x450   : > { %1154 = vmatpush3.bf16.xpose.msk.msra.mxu0 %vm1282_vm1, %v1149_v62  ;;  %1105 = vmatprep.mubr.msk.f32.mxu0 %vm123_vm0, %v518_v6 }
 0x457   : > { %1106 = vmatmul.mubr.msk.f32.vlgmr.msra.gmra.mrb[4].mxu0 %vm123_vm0, %v520_v7 }
 0x522   : > { %v1100_v8 = vpop.f32.mrb[2].mxu0 }
 0x523   : > { %v1350_v9 = vpop.f32.mrb[3].mxu0 }
 0x52a   : > { %v1107_v11 = vpop.f32.mrb[4].mxu0 }
 0x52b   : > { %v599_v12 = vpop.f32.mrb[5].mxu0  ;;  %v611_v13 = vsel %vm211_vm2, %v1107_v11, -inf }
 0x52c   : > { %612 = vmax.xlane.f32.xlu0 %v611_v13  ;;  %v608_v14 = vsel %vm211_vm2, %v599_v12, -inf }
 0x52d   : > { %609 = vmax.xlane.f32.xlu1 %v608_v14 }
 0x53e   : > { %1197 = vrot.lane.b32.xlu1 %v1330_v42, %s1252_s13 }
 0x542   : > { %717 = vrot.lane.b32.xlu1 %v1289_v3, %s1253_s14 }
 0x546   : > { %719 = vrot.lane.b32.xlu1 %v1298_v5, %s1253_s14 }
 0x5b9   : > { %v613_v15 = vpop.xlane.xlu0 %612 }
 0x5ba   : > { %v615_v16 = vsub.f32 %v1107_v11, %v613_v15  ;;  %v610_v17 = vpop.xlane.xlu1 %609 }
 0x5bb   : > { %v614_v18 = vsub.f32 %v599_v12, %v610_v17 }
 0x5bc   : > { %v618_v19 = vmul.f32 1.442695, %v615_v16 }
 0x5bd   : > { %v616_v20 = vmul.f32 1.442695, %v614_v18 }
 0x5be   : > { %1227 = vpow2.f32 %v618_v19  ;;  %v1198_v3 = vpop.permute.xlu1 %1197 }
 0x5bf   : > { %1229 = vpow2.f32 %v616_v20  ;;  %v1200_v25 = vunpack.i.h.bf16 %v1198_v3  ;;  %v1199_v26 = vunpack.i.l.bf16 %v1198_v3 }
 0x5c1   : > { %v1155_v5 = vpack.c.bf16 %v1200_v25, %v1199_v26 }
 0x5c2   : > { %v718_v39 = vpop.permute.xlu1 %717 }
 0x5c3   : > { %1156 = vmatprep.subr.bf16.mxu1 %v1155_v5 }
 0x5c4   : > { %1158 = vmatpush3.bf16.msra.mxu1 %v1155_v5 }
 0x5c8   : > { %v1228_v21 = vpop.eup %1227 }
 0x5c9   : > { %v623_v22 = vsel %vm211_vm2, %v1228_v21, 0.0  ;;  %v1230_v23 = vpop.eup %1229 }
 0x5ca   : > { %624 = vadd.xlane.f32.xlu0 %v623_v22  ;;  %v620_v24 = vsel %vm211_vm2, %v1230_v23, 0.0 }
 0x5ce   : > { %621 = vadd.xlane.f32.xlu0 %v620_v24 }
 0x5e4   : > { %1202 = vrot.lane.b32.xlu0 %v1306_v10, %s1253_s14  ;;  %v720_v10 = vpop.permute.xlu1 %719 }
 0x657   : > { %v625_v27 = vpop.xlane.xlu0 %624 }
 0x658   : > { %1231 = vrcp.f32 %v625_v27 }
 0x65b   : > { %v622_v28 = vpop.xlane.xlu0 %621 }
 0x65c   : > { %1233 = vrcp.f32 %v622_v28 }
 0x65f   : > { %v1203_v29 = vpop.permute.xlu0 %1202 }
 0x660   : > { %v1205_v30 = vunpack.i.h.bf16 %v1203_v29  ;;  %v1204_v31 = vunpack.i.l.bf16 %v1203_v29 }
 0x662   : > { %v1159_v32 = vpack.c.bf16 %v1205_v30, %v1204_v31  ;;  %v1232_v33 = vpop.eup %1231 }
 0x663   : > { %v629_v38 = vmul.f32 %v1232_v33, %v1228_v21 }
 0x664   : > { %1161 = vmatprep.subr.msk.bf16.mxu1 %vm1282_vm1, %v1159_v32 }
 0x666   : > { %v1234_v34 = vpop.eup %1233 }
 0x667   : > { %v628_v35 = vmul.f32 %v1234_v34, %v1230_v23 }
 0x669   : > { %1112 = vmatprep.mubr.msk.f32.mxu1 %vm211_vm2, %v628_v35 }
 0x66a   : > { %1113 = vmatmul.mubr.msk.f32.vlgmr.msra.gmra.mrb[4].mxu1 %vm211_vm2, %v629_v38 }
 0x66b   : > { %1164 = vmatpush3.bf16.xpose.msk.msra.mxu1 %vm1282_vm1, %v1159_v32  ;;  %1119 = vmatprep.mubr.msk.f32.mxu1 %vm123_vm0, %v718_v39 }
 0x672   : > { %1120 = vmatmul.mubr.msk.f32.vlgmr.msra.gmra.mrb[6].mxu1 %vm123_vm0, %v720_v10 }
 0x73d   : > { %v1114_v40 = vpop.f32.mrb[4].mxu1 }
 0x73e   : > { %v708_v41 = vpop.f32.mrb[5].mxu1 }
 0x745   : > { %v1121_v43 = vpop.f32.mrb[6].mxu1 }
 0x746   : > { %v799_v44 = vpop.f32.mrb[7].mxu1  ;;  %v811_v45 = vsel %vm211_vm2, %v1121_v43, -inf }
 0x747   : > { %812 = vmax.xlane.f32.xlu0 %v811_v45  ;;  %v808_v46 = vsel %vm211_vm2, %v799_v44, -inf }
 0x748   : > { %809 = vmax.xlane.f32.xlu1 %v808_v46 }
 0x759   : > { %1207 = vrot.lane.b32.xlu1 %v1330_v42, %s1253_s14 }
 0x75d   : > { %921 = vrot.lane.b32.xlu1 %v1100_v8, %s1253_s14 }
 0x761   : > { %927 = vrot.lane.b32.xlu1 %v708_v41, %s1252_s13 }
 0x765   : > { %929 = vrot.lane.b32.xlu1 %v1114_v40, %s1252_s13 }
 0x7d4   : > { %v813_v0 = vpop.xlane.xlu0 %812 }
 0x7d5   : > { %v815_v47 = vsub.f32 %v1121_v43, %v813_v0  ;;  %v810_v48 = vpop.xlane.xlu1 %809 }
 0x7d6   : > { %v814_v49 = vsub.f32 %v799_v44, %v810_v48 }
 0x7d7   : > { %v818_v50 = vmul.f32 1.442695, %v815_v47 }
 0x7d8   : > { %v816_v51 = vmul.f32 1.442695, %v814_v49 }
 0x7d9   : > { %v1208_v52 = vpop.permute.xlu1 %1207 }
 0x7da   : > { %1235 = vpow2.f32 %v816_v51  ;;  %v1210_v53 = vunpack.i.h.bf16 %v1208_v52  ;;  %v1209_v54 = vunpack.i.l.bf16 %v1208_v52 }
 0x7db   : > { %1237 = vpow2.f32 %v818_v50 }
 0x7dc   : > { %v1165_v55 = vpack.c.bf16 %v1210_v53, %v1209_v54 }
 0x7dd   : > { %v922_v6 = vpop.permute.xlu1 %921 }
 0x7de   : > { %1166 = vmatprep.subr.bf16.mxu0 %v1165_v55  ;;  %v942_v12 = vsel %vm123_vm0, %v1324_v36, %v922_v6 }
 0x7df   : > { %1168 = vmatpush3.bf16.msra.mxu0 %v1165_v55 }
 0x7e1   : > { %v928_v7 = vpop.permute.xlu1 %927 }
 0x7e4   : > { %v1236_v42 = vpop.eup %1235 }
 0x7e5   : > { %v820_v56 = vsel %vm211_vm2, %v1236_v42, 0.0  ;;  %v1238_v57 = vpop.eup %1237 }
 0x7e6   : > { %821 = vadd.xlane.f32.xlu0 %v820_v56  ;;  %v823_v58 = vsel %vm211_vm2, %v1238_v57, 0.0 }
 0x7ea   : > { %824 = vadd.xlane.f32.xlu0 %v823_v58 }
 0x800   : > { %919 = vrot.lane.b32.xlu0 %v1350_v9, %s1253_s14  ;;  %v930_v9 = vpop.permute.xlu1 %929 }
 0x801   : > { %v945_v13 = vsel %vm943_vm3, %v942_v12, %v930_v9 }
 0x873   : > { %v822_v59 = vpop.xlane.xlu0 %821 }
 0x874   : > { %1239 = vrcp.f32 %v822_v59 }
 0x877   : > { %v825_v60 = vpop.xlane.xlu0 %824 }
 0x878   : > { %1241 = vrcp.f32 %v825_v60 }
 0x87b   : > { %v920_v8 = vpop.permute.xlu0 %919 }
 0x87c   : > { %v941_v11 = vsel %vm123_vm0, %v1326_v37, %v920_v8 }
 0x87d   : > { %v944_v16 = vsel %vm943_vm3, %v941_v11, %v928_v7 }
 0x87e   : > { %v1240_v61 = vpop.eup %1239 }
 0x87f   : > { %v828_v62 = vmul.f32 %v1240_v61, %v1236_v42 }
 0x881   : > { %1126 = vmatprep.mubr.msk.f32.mxu0 %vm211_vm2, %v828_v62 }
 0x882   : > { %v1242_v63 = vpop.eup %1241 }
 0x883   : > { %v829_v1 = vmul.f32 %v1242_v63, %v1238_v57 }
 0x885   : > { %1127 = vmatmul.mubr.msk.f32.vlgmr.msra.gmra.mrb[6].mxu0 %vm211_vm2, %v829_v1 }
 0x958   : > { %v1128_v2 = vpop.f32.mrb[6].mxu0 }
 0x959   : > { %937 = vrot.lane.b32.xlu1 %v1128_v2, %s1251_s12  ;;  %v908_v4 = vpop.f32.mrb[7].mxu0 }
 0x95a   : > { %935 = vrot.lane.b32.xlu0 %v908_v4, %s1251_s12 }
 0x9cb   : > { %v938_v14 = vpop.permute.xlu1 %937 }
 0x9cc   : > { %v948_v15 = vsel %vm946_vm4, %v945_v13, %v938_v14  ;;  %v936_v17 = vpop.permute.xlu0 %935 }
 0x9cd   : > { %950 = vst [vmem:[%s116_s18 + $0x8] sm:$0xff] %v948_v15  ;;  %v947_v18 = vsel %vm946_vm4, %v944_v16, %v936_v17 }
 0x9ce   : > { %949 = vst [vmem:[%s116_s18] sm:$0xff] %v947_v18 }
 0x9cf PF: > { %s11_s6 = sadd.s32 1, %s1249_s6  }
 0x9d0   : > { %p8_p4 = scmp.ge.s32.totalorder %s11_s6, 4  }
 0x9d2   :  { %10 = sbr.rel (!%p8_p4) target bundleno = 1 (0x1), region = 54 }

// kernel: transformer_encoder_layer.6
= control target key start
LH: loop header
LB: loop body
LE: loop exit
PB: predicated region body
PF: predicated region fallthrough
CT: control target
= control target key end

     0   :  { %s494_s1 = inlined_call_operand.vmem [shape: f32[128,128], index: 1, kind: input, shape index: {}]   ;;  %s495_s0 = inlined_call_operand.vmem [shape: f32[32,128], index: 0, kind: input, shape index: {}]   ;;  %s496_s2 = inlined_call_operand.vmem [shape: f32[1,128], index: 2, kind: input, shape index: {}]   ;;  %s497_s3 = inlined_call_operand.vmem [shape: f32[32,128], index: 3, kind: input, shape index: {}]   ;;  %s498_s4 = inlined_call_operand.vmem [shape: f32[1,128], index: 4, kind: input, shape index: {}]   ;;  %s499_s5 = inlined_call_operand.vmem [shape: f32[1,128], index: 5, kind: input, shape index: {}]   ;;  %s500_s6 = inlined_call_operand.vmem [shape: f32[32,128], index: 6, kind: output, shape index: {}]  }
   0x1   :  { %v39_v0 = vld [vmem:[%s494_s1] sm:$0xff]  ;;  %v40_v1 = vld [vmem:[%s494_s1 + $0x8] sm:$0xff]  ;;  %v41_v2 = vld [vmem:[%s494_s1 + $0x10] sm:$0xff] }
   0x2   :  { %v310_v3 = vpack.c.bf16 %v40_v1, %v39_v0  ;;  %v42_v4 = vld [vmem:[%s494_s1 + $0x18] sm:$0xff]  ;;  %v43_v6 = vld [vmem:[%s494_s1 + $0x20] sm:$0xff]  ;;  %v44_v7 = vld [vmem:[%s494_s1 + $0x28] sm:$0xff] }
   0x3   :  { %v314_v5 = vpack.c.bf16 %v42_v4, %v41_v2  ;;  %v318_v8 = vpack.c.bf16 %v44_v7, %v43_v6  ;;  %v35_v9 = vld [vmem:[%s495_s0] sm:$0xff]  ;;  %v37_v10 = vld [vmem:[%s495_s0 + $0x10] sm:$0xff]  ;;  %v46_v12 = vld [vmem:[%s494_s1 + $0x38] sm:$0xff] }
   0x4   :  { %311 = vmatprep.subr.bf16.mxu0 %v310_v3  ;;  %342 = vmatprep.subr.bf16.mxu1 %v310_v3  ;;  %v45_v11 = vld [vmem:[%s494_s1 + $0x30] sm:$0xff]  ;;  %v47_v14 = vld [vmem:[%s494_s1 + $0x40] sm:$0xff]  ;;  %v48_v15 = vld [vmem:[%s494_s1 + $0x48] sm:$0xff] }
   0x5   :  { %313 = vmatpush3.bf16.msra.mxu0 %v310_v3  ;;  %350 = vmatpush3.bf16.msra.mxu1 %v310_v3  ;;  %v322_v13 = vpack.c.bf16 %v46_v12, %v45_v11  ;;  %v326_v16 = vpack.c.bf16 %v48_v15, %v47_v14  ;;  %v49_v17 = vld [vmem:[%s494_s1 + $0x50] sm:$0xff]  ;;  %v50_v18 = vld [vmem:[%s494_s1 + $0x58] sm:$0xff]  ;;  %v51_v20 = vld [vmem:[%s494_s1 + $0x60] sm:$0xff] }
   0x6   :  { %315 = vmatprep.subr.bf16.mxu0 %v314_v5  ;;  %343 = vmatprep.subr.bf16.mxu1 %v314_v5  ;;  %v330_v19 = vpack.c.bf16 %v50_v18, %v49_v17  ;;  %v52_v21 = vld [vmem:[%s494_s1 + $0x68] sm:$0xff]  ;;  %v53_v23 = vld [vmem:[%s494_s1 + $0x70] sm:$0xff]  ;;  %v54_v24 = vld [vmem:[%s494_s1 + $0x78] sm:$0xff] }
   0x7   :  { %304 = vmatprep.mubr.f32.mxu0 %v35_v9  ;;  %307 = vmatprep.mubr.f32.mxu1 %v37_v10  ;;  %v334_v22 = vpack.c.bf16 %v52_v21, %v51_v20  ;;  %v338_v25 = vpack.c.bf16 %v54_v24, %v53_v23  ;;  %v36_v26 = vld [vmem:[%s495_s0 + $0x8] sm:$0xff]  ;;  %v38_v27 = vld [vmem:[%s495_s0 + $0x18] sm:$0xff]  ;;  %v249_v28 = vld [vmem:[%s496_s2] ss:$0 sm:$0xff] }
   0x8   :  { %v168_v33 = vld [vmem:[%s497_s3 + $0x10] sm:$0xff]  ;;  %v166_v34 = vld [vmem:[%s497_s3] sm:$0xff]  ;;  %v169_v38 = vld [vmem:[%s497_s3 + $0x18] sm:$0xff] }
   0x9   :  { %317 = vmatpush3.bf16.msra.mxu0 %v314_v5  ;;  %351 = vmatpush3.bf16.msra.mxu1 %v314_v5  ;;  %v167_v42 = vld [vmem:[%s497_s3 + $0x8] sm:$0xff]  ;;  %v250_v10 = vld [vmem:[%s498_s4] ss:$0 sm:$0xff] }
   0xa   :  { %319 = vmatprep.subr.bf16.mxu0 %v318_v8  ;;  %344 = vmatprep.subr.bf16.mxu1 %v318_v8  ;;  %v251_v12 = vld [vmem:[%s499_s5] ss:$0 sm:$0xff] }
   0xd   :  { %321 = vmatpush3.bf16.msra.mxu0 %v318_v8  ;;  %352 = vmatpush3.bf16.msra.mxu1 %v318_v8 }
   0xe   :  { %323 = vmatprep.subr.bf16.mxu0 %v322_v13  ;;  %345 = vmatprep.subr.bf16.mxu1 %v322_v13 }
  0x11   :  { %325 = vmatpush3.bf16.msra.mxu0 %v322_v13  ;;  %353 = vmatpush3.bf16.msra.mxu1 %v322_v13 }
  0x12   :  { %327 = vmatprep.subr.bf16.mxu0 %v326_v16  ;;  %346 = vmatprep.subr.bf16.mxu1 %v326_v16 }
  0x15   :  { %329 = vmatpush3.bf16.msra.mxu0 %v326_v16  ;;  %354 = vmatpush3.bf16.msra.mxu1 %v326_v16 }
  0x16   :  { %331 = vmatprep.subr.bf16.mxu0 %v330_v19  ;;  %347 = vmatprep.subr.bf16.mxu1 %v330_v19 }
  0x19   :  { %333 = vmatpush3.bf16.msra.mxu0 %v330_v19  ;;  %355 = vmatpush3.bf16.msra.mxu1 %v330_v19 }
  0x1a   :  { %335 = vmatprep.subr.bf16.mxu0 %v334_v22  ;;  %348 = vmatprep.subr.bf16.mxu1 %v334_v22 }
  0x1d   :  { %337 = vmatpush3.bf16.msra.mxu0 %v334_v22  ;;  %356 = vmatpush3.bf16.msra.mxu1 %v334_v22 }
  0x1e   :  { %339 = vmatprep.subr.bf16.mxu0 %v338_v25  ;;  %349 = vmatprep.subr.bf16.mxu1 %v338_v25 }
  0x21   :  { %341 = vmatpush3.bf16.msra.mxu0 %v338_v25  ;;  %357 = vmatpush3.bf16.msra.mxu1 %v338_v25 }
  0x24   :  { %305 = vmatmul.mubr.f32.vlgmr.msra.gmra.mrb[0].mxu0 %v36_v26  ;;  %308 = vmatmul.mubr.f32.vlgmr.msra.gmra.mrb[0].mxu1 %v38_v27 }
  0xf7   :  { %v306_v29 = vpop.f32.mrb[0].mxu0  ;;  %v309_v30 = vpop.f32.mrb[0].mxu1 }
  0xf8   :  { %v121_v31 = vpop.f32.mrb[1].mxu0  ;;  %v131_v32 = vpop.f32.mrb[1].mxu1  ;;  %v165_v35 = vadd.f32 %v309_v30, %v249_v28  ;;  %v163_v39 = vadd.f32 %v306_v29, %v249_v28 }
  0xf9   :  { %v162_v36 = vadd.f32 %v249_v28, %v121_v31  ;;  %v164_v37 = vadd.f32 %v249_v28, %v131_v32 }
  0xfa   :  { %v173_v43 = vadd.f32 %v169_v38, %v165_v35  ;;  %v171_v44 = vadd.f32 %v167_v42, %v163_v39 }
  0xfb   :  { %v172_v40 = vadd.f32 %v168_v33, %v164_v37  ;;  %v170_v41 = vadd.f32 %v166_v34, %v162_v36 }
  0xfd   :  { %178 = vadd.xlane.f32.xlu1 %v172_v40  ;;  %174 = vadd.xlane.f32.xlu0 %v170_v41 }
 0x101   :  { %180 = vadd.xlane.f32.xlu1 %v173_v43  ;;  %176 = vadd.xlane.f32.xlu0 %v171_v44 }
 0x18a   :  { %v179_v45 = vpop.xlane.xlu1 %178  ;;  %v175_v46 = vpop.xlane.xlu0 %174 }
 0x18b   :  { %v185_v47 = vmul.f32 0.0078125, %v179_v45  ;;  %v183_v48 = vmul.f32 0.0078125, %v175_v46 }
 0x18d   :  { %v187_v49 = vsub.f32 %v170_v41, %v183_v48  ;;  %v189_v52 = vsub.f32 %v172_v40, %v185_v47 }
 0x18e   :  { %v181_v50 = vpop.xlane.xlu1 %180  ;;  %v177_v51 = vpop.xlane.xlu0 %176 }
 0x18f   :  { %v186_v53 = vmul.f32 0.0078125, %v181_v50  ;;  %v184_v54 = vmul.f32 0.0078125, %v177_v51  ;;  %v191_v55 = vmul.f32 %v187_v49, %v187_v49  ;;  %v193_v58 = vmul.f32 %v189_v52, %v189_v52 }
 0x191   :  { %v188_v56 = vsub.f32 %v171_v44, %v184_v54  ;;  %195 = vadd.xlane.f32.xlu0 %v191_v55  ;;  %v190_v57 = vsub.f32 %v173_v43, %v186_v53 }
 0x193   :  { %v192_v59 = vmul.f32 %v188_v56, %v188_v56  ;;  %v194_v60 = vmul.f32 %v190_v57, %v190_v57 }
 0x195   :  { %199 = vadd.xlane.f32.xlu0 %v193_v58  ;;  %197 = vadd.xlane.f32.xlu1 %v192_v59 }
 0x199   :  { %201 = vadd.xlane.f32.xlu1 %v194_v60 }
 0x21e   :  { %v196_v61 = vpop.xlane.xlu0 %195 }
 0x21f   :  { %v203_v62 = vmul.f32 0.0078125, %v196_v61 }
 0x221   :  { %v207_v63 = vadd.f32 1e-05, %v203_v62 }
 0x222   :  { %v198_v0 = vpop.xlane.xlu1 %197  ;;  %v200_v1 = vpop.xlane.xlu0 %199 }
 0x223   :  { %358 = vrsqrt.f32 %v207_v63  ;;  %v204_v2 = vmul.f32 0.0078125, %v198_v0  ;;  %v205_v3 = vmul.f32 0.0078125, %v200_v1 }
 0x225   :  { %v208_v4 = vadd.f32 1e-05, %v204_v2  ;;  %v209_v5 = vadd.f32 1e-05, %v205_v3 }
 0x226   :  { %v202_v6 = vpop.xlane.xlu1 %201 }
 0x227   :  { %360 = vrsqrt.f32 %v208_v4  ;;  %v206_v7 = vmul.f32 0.0078125, %v202_v6 }
 0x228   :  { %362 = vrsqrt.f32 %v209_v5 }
 0x229   :  { %v210_v8 = vadd.f32 1e-05, %v206_v7 }
 0x22b   :  { %364 = vrsqrt.f32 %v210_v8 }
 0x22d   :  { %v359_v9 = vpop.eup %358 }
 0x22e   :  { %v215_v11 = vmul.f32 %v359_v9, %v187_v49 }
 0x230   :  { %v226_v13 = vmul.f32 %v250_v10, %v215_v11 }
 0x231   :  { %v361_v14 = vpop.eup %360 }
 0x232   :  { %v363_v15 = vpop.eup %362  ;;  %v237_v16 = vadd.f32 %v251_v12, %v226_v13  ;;  %v216_v17 = vmul.f32 %v361_v14, %v188_v56 }
 0x233   :  { %v217_v18 = vmul.f32 %v363_v15, %v189_v52 }
 0x234   :  { %241 = vst [vmem:[%s500_s6] sm:$0xff] %v237_v16  ;;  %v227_v19 = vmul.f32 %v250_v10, %v216_v17 }
 0x235   :  { %v365_v20 = vpop.eup %364  ;;  %v228_v21 = vmul.f32 %v250_v10, %v217_v18 }
 0x236   :  { %v238_v22 = vadd.f32 %v251_v12, %v227_v19  ;;  %v218_v23 = vmul.f32 %v365_v20, %v190_v57 }
 0x237   :  { %v239_v24 = vadd.f32 %v251_v12, %v228_v21 }
 0x238   :  { %242 = vst [vmem:[%s500_s6 + $0x8] sm:$0xff] %v238_v22  ;;  %v229_v25 = vmul.f32 %v250_v10, %v218_v23 }
 0x239   :  { %243 = vst [vmem:[%s500_s6 + $0x10] sm:$0xff] %v239_v24 }
 0x23a   :  { %v240_v26 = vadd.f32 %v251_v12, %v229_v25 }
 0x23c   :  { %244 = vst [vmem:[%s500_s6 + $0x18] sm:$0xff] %v240_v26 }

// kernel: transformer_encoder_layer.7
= control target key start
LH: loop header
LB: loop body
LE: loop exit
PB: predicated region body
PF: predicated region fallthrough
CT: control target
= control target key end

     0   :  { %v529_v3 = vmov 0.0   ;;  %s818_s1 = inlined_call_operand.vmem [shape: f32[128,256], index: 1, kind: input, shape index: {}]   ;;  %s819_s3 = inlined_call_operand.vmem [shape: f32[256,128], index: 3, kind: input, shape index: {}]   ;;  %s820_s0 = inlined_call_operand.vmem [shape: f32[32,128], index: 0, kind: input, shape index: {}]   ;;  %s821_s2 = inlined_call_operand.vmem [shape: f32[1,256], index: 2, kind: input, shape index: {}]   ;;  %s822_s4 = inlined_call_operand.vmem [shape: f32[1,128], index: 4, kind: input, shape index: {}]   ;;  %s823_s5 = inlined_call_operand.vmem [shape: f32[1,128], index: 5, kind: input, shape index: {}]   ;;  %s824_s6 = inlined_call_operand.vmem [shape: f32[1,128], index: 6, kind: input, shape index: {}]   ;;  %s825_s7 = inlined_call_operand.vmem [shape: f32[32,128], index: 7, kind: output, shape index: {}]  }
   0x1   :  { %v39_v0 = vld [vmem:[%s818_s1 + $0x8] sm:$0xff]  ;;  %v41_v1 = vld [vmem:[%s818_s1 + $0x18] sm:$0xff]  ;;  %v38_v2 = vld [vmem:[%s818_s1] sm:$0xff]  ;;  %146 = vmatprep.mubr.f32.mxu0 %v529_v3 }
   0x2   :  { %v456_v4 = vpack.c.bf16 %v41_v1, %v39_v0  ;;  %v40_v5 = vld [vmem:[%s818_s1 + $0x10] sm:$0xff]  ;;  %v43_v6 = vld [vmem:[%s818_s1 + $0x28] sm:$0xff]  ;;  %v45_v7 = vld [vmem:[%s818_s1 + $0x38] sm:$0xff] }
   0x3   :  { %v458_v8 = vpack.c.bf16 %v40_v5, %v38_v2  ;;  %v460_v9 = vpack.c.bf16 %v45_v7, %v43_v6  ;;  %v42_v10 = vld [vmem:[%s818_s1 + $0x20] sm:$0xff]  ;;  %v44_v11 = vld [vmem:[%s818_s1 + $0x30] sm:$0xff]  ;;  %v47_v12 = vld [vmem:[%s818_s1 + $0x48] sm:$0xff] }
   0x4   :  { %457 = vmatprep.subr.bf16.mxu0 %v456_v4  ;;  %v49_v13 = vld [vmem:[%s818_s1 + $0x58] sm:$0xff]  ;;  %v462_v14 = vpack.c.bf16 %v44_v11, %v42_v10  ;;  %v46_v16 = vld [vmem:[%s818_s1 + $0x40] sm:$0xff]  ;;  %v48_v17 = vld [vmem:[%s818_s1 + $0x50] sm:$0xff] }
   0x5   :  { %459 = vmatpush1.bf16.msra.mxu0 %v458_v8  ;;  %v464_v15 = vpack.c.bf16 %v49_v13, %v47_v12  ;;  %v51_v18 = vld [vmem:[%s818_s1 + $0x68] sm:$0xff]  ;;  %v53_v19 = vld [vmem:[%s818_s1 + $0x78] sm:$0xff]  ;;  %v466_v20 = vpack.c.bf16 %v48_v17, %v46_v16  ;;  %v50_v22 = vld [vmem:[%s818_s1 + $0x60] sm:$0xff] }
   0x6   :  { %461 = vmatprep.subr.bf16.mxu0 %v460_v9  ;;  %v468_v21 = vpack.c.bf16 %v53_v19, %v51_v18  ;;  %v52_v23 = vld [vmem:[%s818_s1 + $0x70] sm:$0xff]  ;;  %v55_v24 = vld [vmem:[%s818_s1 + $0x88] sm:$0xff]  ;;  %v57_v25 = vld [vmem:[%s818_s1 + $0x98] sm:$0xff] }
   0x7   :  { %v54_v26 = vld [vmem:[%s818_s1 + $0x80] sm:$0xff]  ;;  %v56_v27 = vld [vmem:[%s818_s1 + $0x90] sm:$0xff]  ;;  %v470_v28 = vpack.c.bf16 %v52_v23, %v50_v22  ;;  %v59_v29 = vld [vmem:[%s818_s1 + $0xa8] sm:$0xff]  ;;  %v472_v34 = vpack.c.bf16 %v57_v25, %v55_v24 }
   0x8   :  { %v61_v30 = vld [vmem:[%s818_s1 + $0xb8] sm:$0xff]  ;;  %v199_v31 = vld [vmem:[%s819_s3 + $0x80] sm:$0xff]  ;;  %v200_v32 = vld [vmem:[%s819_s3 + $0x88] sm:$0xff]  ;;  %v474_v45 = vpack.c.bf16 %v56_v27, %v54_v26 }
   0x9   :  { %463 = vmatpush1.bf16.msra.mxu0 %v462_v14  ;;  %v183_v33 = vld [vmem:[%s819_s3] sm:$0xff]  ;;  %v488_v35 = vpack.c.bf16 %v200_v32, %v199_v31  ;;  %v184_v36 = vld [vmem:[%s819_s3 + $0x8] sm:$0xff]  ;;  %v201_v37 = vld [vmem:[%s819_s3 + $0x90] sm:$0xff]  ;;  %v476_v49 = vpack.c.bf16 %v61_v30, %v59_v29 }
   0xa   :  { %465 = vmatprep.subr.bf16.mxu0 %v464_v15  ;;  %v202_v38 = vld [vmem:[%s819_s3 + $0x98] sm:$0xff]  ;;  %v490_v39 = vpack.c.bf16 %v184_v36, %v183_v33  ;;  %v185_v41 = vld [vmem:[%s819_s3 + $0x10] sm:$0xff]  ;;  %v203_v43 = vld [vmem:[%s819_s3 + $0xa0] sm:$0xff] }
   0xb   :  { %v492_v40 = vpack.c.bf16 %v202_v38, %v201_v37  ;;  %v186_v42 = vld [vmem:[%s819_s3 + $0x18] sm:$0xff]  ;;  %489 = vmatprep.subr.bf16.mxu1 %v488_v35  ;;  %v204_v44 = vld [vmem:[%s819_s3 + $0xa8] sm:$0xff]  ;;  %v58_v46 = vld [vmem:[%s818_s1 + $0xa0] sm:$0xff]  ;;  %v72_v37 = vlaneseq }
   0xc   :  { %v60_v47 = vld [vmem:[%s818_s1 + $0xb0] sm:$0xff]  ;;  %491 = vmatpush3.bf16.msra.mxu1 %v490_v39  ;;  %v494_v48 = vpack.c.bf16 %v186_v42, %v185_v41  ;;  %v63_v50 = vld [vmem:[%s818_s1 + $0xc8] sm:$0xff]  ;;  %v496_v51 = vpack.c.bf16 %v204_v44, %v203_v43  ;;  %v187_v52 = vld [vmem:[%s819_s3 + $0x20] sm:$0xff] }
   0xd   :  { %467 = vmatpush1.bf16.msra.mxu0 %v466_v20  ;;  %493 = vmatprep.subr.bf16.mxu1 %v492_v40  ;;  %v188_v53 = vld [vmem:[%s819_s3 + $0x28] sm:$0xff]  ;;  %v65_v54 = vld [vmem:[%s818_s1 + $0xd8] sm:$0xff]  ;;  %v205_v55 = vld [vmem:[%s819_s3 + $0xb0] sm:$0xff]  ;;  %v478_v57 = vpack.c.bf16 %v60_v47, %v58_v46  ;;  %v73_v38 = vshrl.u32 %v72_v37, 7 }
   0xe   :  { %469 = vmatprep.subr.bf16.mxu0 %v468_v21  ;;  %v206_v56 = vld [vmem:[%s819_s3 + $0xb8] sm:$0xff]  ;;  %v62_v58 = vld [vmem:[%s818_s1 + $0xc0] sm:$0xff]  ;;  %v64_v59 = vld [vmem:[%s818_s1 + $0xd0] sm:$0xff]  ;;  %v498_v60 = vpack.c.bf16 %v188_v53, %v187_v52  ;;  %v480_v61 = vpack.c.bf16 %v65_v54, %v63_v50 }
   0xf   :  { %v67_v62 = vld [vmem:[%s818_s1 + $0xe8] sm:$0xff]  ;;  %v500_v63 = vpack.c.bf16 %v206_v56, %v205_v55  ;;  %v189_v0 = vld [vmem:[%s819_s3 + $0x30] sm:$0xff]  ;;  %v190_v1 = vld [vmem:[%s819_s3 + $0x38] sm:$0xff]  ;;  %v482_v6 = vpack.c.bf16 %v64_v59, %v62_v58  ;;  %v74_v39 = vsub.s32 0, %v73_v38  ;;  %v78_v41 = vsub.s32 1, %v73_v38 }
  0x10   :  { %495 = vmatpush3.bf16.msra.mxu1 %v494_v48  ;;  %v69_v2 = vld [vmem:[%s818_s1 + $0xf8] sm:$0xff]  ;;  %v207_v4 = vld [vmem:[%s819_s3 + $0xc0] sm:$0xff]  ;;  %v208_v5 = vld [vmem:[%s819_s3 + $0xc8] sm:$0xff]  ;;  %v502_v8 = vpack.c.bf16 %v190_v1, %v189_v0 }
  0x11   :  { %471 = vmatpush1.bf16.msra.mxu0 %v470_v28  ;;  %497 = vmatprep.subr.bf16.mxu1 %v496_v51  ;;  %v66_v7 = vld [vmem:[%s818_s1 + $0xe0] sm:$0xff]  ;;  %v484_v9 = vpack.c.bf16 %v69_v2, %v67_v62  ;;  %v68_v10 = vld [vmem:[%s818_s1 + $0xf0] sm:$0xff]  ;;  %v504_v11 = vpack.c.bf16 %v208_v5, %v207_v4  ;;  %v192_v13 = vld [vmem:[%s819_s3 + $0x48] sm:$0xff] }
  0x12   :  { %473 = vmatprep.subr.bf16.mxu0 %v472_v34  ;;  %v191_v12 = vld [vmem:[%s819_s3 + $0x40] sm:$0xff]  ;;  %v209_v14 = vld [vmem:[%s819_s3 + $0xd0] sm:$0xff]  ;;  %v210_v15 = vld [vmem:[%s819_s3 + $0xd8] sm:$0xff]  ;;  %v486_v16 = vpack.c.bf16 %v68_v10, %v66_v7 }
  0x13   :  { %v506_v17 = vpack.c.bf16 %v192_v13, %v191_v12  ;;  %v508_v18 = vpack.c.bf16 %v210_v15, %v209_v14  ;;  %v193_v19 = vld [vmem:[%s819_s3 + $0x50] sm:$0xff]  ;;  %v194_v20 = vld [vmem:[%s819_s3 + $0x58] sm:$0xff]  ;;  %v211_v21 = vld [vmem:[%s819_s3 + $0xe0] sm:$0xff] }
  0x14   :  { %499 = vmatpush3.bf16.msra.mxu1 %v498_v60  ;;  %v212_v22 = vld [vmem:[%s819_s3 + $0xe8] sm:$0xff]  ;;  %v748_v23 = vld [vmem:[%s820_s0] sm:$0xff]  ;;  %v510_v24 = vpack.c.bf16 %v194_v20, %v193_v19  ;;  %v762_v27 = vld [vmem:[%s820_s0 + $0x10] sm:$0xff] }
  0x15   :  { %475 = vmatpush1.bf16.msra.mxu0 %v474_v45  ;;  %501 = vmatprep.subr.bf16.mxu1 %v500_v63  ;;  %v512_v25 = vpack.c.bf16 %v212_v22, %v211_v21  ;;  %v755_v26 = vld [vmem:[%s820_s0 + $0x8] sm:$0xff]  ;;  %v769_v28 = vld [vmem:[%s820_s0 + $0x18] sm:$0xff]  ;;  %v195_v29 = vld [vmem:[%s819_s3 + $0x60] sm:$0xff] }
  0x16   :  { %477 = vmatprep.subr.bf16.mxu0 %v476_v49  ;;  %v196_v30 = vld [vmem:[%s819_s3 + $0x68] sm:$0xff]  ;;  %v214_v32 = vld [vmem:[%s819_s3 + $0xf8] sm:$0xff]  ;;  %v197_v34 = vld [vmem:[%s819_s3 + $0x70] sm:$0xff] }
  0x17   :  { %v514_v31 = vpack.c.bf16 %v196_v30, %v195_v29  ;;  %v198_v35 = vld [vmem:[%s819_s3 + $0x78] sm:$0xff]  ;;  %v70_v40 = vld [vmem:[%s821_s2] sm:$0x3] }
  0x18   :  { %503 = vmatpush3.bf16.msra.mxu1 %v502_v8  ;;  %v518_v36 = vpack.c.bf16 %v198_v35, %v197_v34  ;;  %v75_v42 = vrot.slane %v70_v40, %v74_v39  ;;  %v79_v43 = vrot.slane %v70_v40, %v78_v41  ;;  %v409_v7 = vld [vmem:[%s822_s4] ss:$0 sm:$0xff] }
  0x19   :  { %479 = vmatpush1.bf16.msra.mxu0 %v478_v57  ;;  %505 = vmatprep.subr.bf16.mxu1 %v504_v11 }
  0x1a   :  { %481 = vmatprep.subr.bf16.mxu0 %v480_v61 }
  0x1c   :  { %507 = vmatpush3.bf16.msra.mxu1 %v506_v17 }
  0x1d   :  { %483 = vmatpush1.bf16.msra.mxu0 %v482_v6  ;;  %509 = vmatprep.subr.bf16.mxu1 %v508_v18 }
  0x1e   :  { %485 = vmatprep.subr.bf16.mxu0 %v484_v9 }
  0x20   :  { %511 = vmatpush3.bf16.msra.mxu1 %v510_v24 }
  0x21   :  { %487 = vmatpush1.bf16.msra.mxu0 %v486_v16  ;;  %513 = vmatprep.subr.bf16.mxu1 %v512_v25 }
  0x24   :  { %147 = vmatmul.mubr.f32.vlgmr.msra.gmra.mrb[0].mxu0 %v748_v23  ;;  %515 = vmatpush3.bf16.msra.mxu1 %v514_v31 }
  0x25   :  { %152 = vmatprep.mubr.f32.mxu0 %v529_v3 }
  0x28   :  { %153 = vmatmul.mubr.f32.gmra.mrb[2].mxu0 %v755_v26 }
  0x29   :  { %158 = vmatprep.mubr.f32.mxu0 %v529_v3 }
  0x2c   :  { %159 = vmatmul.mubr.f32.gmra.mrb[4].mxu0 %v762_v27 }
  0x2d   :  { %164 = vmatprep.mubr.f32.mxu0 %v529_v3  ;;  %v213_v3 = vld [vmem:[%s819_s3 + $0xf0] sm:$0xff] }
  0x2e   :  { %v516_v33 = vpack.c.bf16 %v214_v32, %v213_v3 }
  0x30   :  { %165 = vmatmul.mubr.f32.gmra.mrb[6].mxu0 %v769_v28  ;;  %517 = vmatprep.subr.bf16.mxu1 %v516_v33 }
  0x31   :  { %519 = vmatpush3.bf16.msra.mxu1 %v518_v36 }
  0xf7   :  { %v148_v44 = vpop.f32.mrb[0].mxu0 }
  0xf8   :  { %v149_v45 = vadd.f32 %v148_v44, %v75_v42  ;;  %v150_v46 = vpop.f32.mrb[1].mxu0 }
  0xf9   :  { %v151_v47 = vadd.f32 %v150_v46, %v79_v43 }
  0xfa   :  { %v171_v50 = vmax.f32 %v149_v45, 0.0 }
  0xfb   :  { %v154_v48 = vpop.f32.mrb[2].mxu0  ;;  %v172_v49 = vmax.f32 %v151_v47, 0.0 }
  0xfc   :  { %v155_v51 = vadd.f32 %v154_v48, %v75_v42  ;;  %v156_v52 = vpop.f32.mrb[3].mxu0 }
  0xfd   :  { %v157_v53 = vadd.f32 %v156_v52, %v79_v43  ;;  %279 = vmatprep.mubr.f32.mxu1 %v172_v49 }
  0xfe   :  { %280 = vmatmul.mubr.f32.vlgmr.msra.gmra.mrb[0].mxu1 %v171_v50  ;;  %v173_v56 = vmax.f32 %v155_v51, 0.0 }
  0xff   :  { %v174_v54 = vmax.f32 %v157_v53, 0.0  ;;  %v160_v55 = vpop.f32.mrb[4].mxu0  ;;  %v410_v53 = vld [vmem:[%s823_s5] ss:$0 sm:$0xff] }
 0x100   :  { %v161_v57 = vadd.f32 %v160_v55, %v75_v42  ;;  %v162_v58 = vpop.f32.mrb[5].mxu0 }
 0x101   :  { %v163_v59 = vadd.f32 %v162_v58, %v79_v43  ;;  %284 = vmatprep.mubr.f32.mxu1 %v174_v54 }
 0x102   :  { %285 = vmatmul.mubr.f32.gmra.mrb[2].mxu1 %v173_v56  ;;  %v175_v62 = vmax.f32 %v161_v57, 0.0  ;;  %v411_v56 = vld [vmem:[%s824_s6] ss:$0 sm:$0xff] }
 0x103   :  { %v176_v60 = vmax.f32 %v163_v59, 0.0  ;;  %v166_v61 = vpop.f32.mrb[6].mxu0 }
 0x104   :  { %v167_v63 = vadd.f32 %v166_v61, %v75_v42  ;;  %v168_v0 = vpop.f32.mrb[7].mxu0 }
 0x105   :  { %v169_v1 = vadd.f32 %v168_v0, %v79_v43  ;;  %289 = vmatprep.mubr.f32.mxu1 %v176_v60 }
 0x106   :  { %290 = vmatmul.mubr.f32.gmra.mrb[4].mxu1 %v175_v62  ;;  %v177_v4 = vmax.f32 %v167_v63, 0.0 }
 0x107   :  { %v178_v2 = vmax.f32 %v169_v1, 0.0 }
 0x109   :  { %294 = vmatprep.mubr.f32.mxu1 %v178_v2 }
 0x10a   :  { %295 = vmatmul.mubr.f32.gmra.mrb[6].mxu1 %v177_v4 }
 0x1d1   :  { %v444_v5 = vpop.f32.mrb[0].mxu1 }
 0x1d2   :  { %v445_v6 = vpop.f32.mrb[1].mxu1 }
 0x1d3   :  { %v446_v8 = vadd.f32 %v445_v6, %v444_v5 }
 0x1d5   :  { %v322_v9 = vadd.f32 %v446_v8, %v409_v7  ;;  %v447_v10 = vpop.f32.mrb[2].mxu1 }
 0x1d6   :  { %v448_v11 = vpop.f32.mrb[3].mxu1 }
 0x1d7   :  { %v449_v12 = vadd.f32 %v448_v11, %v447_v10  ;;  %v330_v13 = vadd.f32 %v322_v9, %v748_v23 }
 0x1d9   :  { %v323_v14 = vadd.f32 %v449_v12, %v409_v7  ;;  %v450_v15 = vpop.f32.mrb[4].mxu1  ;;  %334 = vadd.xlane.f32.xlu0 %v330_v13 }
 0x1da   :  { %v451_v16 = vpop.f32.mrb[5].mxu1 }
 0x1db   :  { %v452_v17 = vadd.f32 %v451_v16, %v450_v15  ;;  %v331_v18 = vadd.f32 %v323_v14, %v755_v26 }
 0x1dd   :  { %v324_v19 = vadd.f32 %v452_v17, %v409_v7  ;;  %v453_v20 = vpop.f32.mrb[6].mxu1  ;;  %336 = vadd.xlane.f32.xlu0 %v331_v18 }
 0x1de   :  { %v454_v21 = vpop.f32.mrb[7].mxu1 }
 0x1df   :  { %v455_v22 = vadd.f32 %v454_v21, %v453_v20  ;;  %v332_v24 = vadd.f32 %v324_v19, %v762_v27 }
 0x1e1   :  { %v325_v25 = vadd.f32 %v455_v22, %v409_v7  ;;  %338 = vadd.xlane.f32.xlu1 %v332_v24 }
 0x1e3   :  { %v333_v29 = vadd.f32 %v325_v25, %v769_v28 }
 0x1e5   :  { %340 = vadd.xlane.f32.xlu1 %v333_v29 }
 0x266   :  { %v335_v23 = vpop.xlane.xlu0 %334 }
 0x267   :  { %v343_v30 = vmul.f32 0.0078125, %v335_v23 }
 0x269   :  { %v347_v31 = vsub.f32 %v330_v13, %v343_v30 }
 0x26a   :  { %v337_v3 = vpop.xlane.xlu0 %336 }
 0x26b   :  { %v344_v32 = vmul.f32 0.0078125, %v337_v3  ;;  %v351_v33 = vmul.f32 %v347_v31, %v347_v31 }
 0x26d   :  { %v348_v34 = vsub.f32 %v331_v18, %v344_v32  ;;  %355 = vadd.xlane.f32.xlu0 %v351_v33 }
 0x26e   :  { %v339_v26 = vpop.xlane.xlu1 %338 }
 0x26f   :  { %v345_v35 = vmul.f32 0.0078125, %v339_v26  ;;  %v352_v36 = vmul.f32 %v348_v34, %v348_v34 }
 0x271   :  { %v349_v37 = vsub.f32 %v332_v24, %v345_v35  ;;  %357 = vadd.xlane.f32.xlu1 %v352_v36 }
 0x272   :  { %v341_v38 = vpop.xlane.xlu1 %340 }
 0x273   :  { %v346_v27 = vmul.f32 0.0078125, %v341_v38  ;;  %v353_v39 = vmul.f32 %v349_v37, %v349_v37 }
 0x275   :  { %v350_v40 = vsub.f32 %v333_v29, %v346_v27  ;;  %359 = vadd.xlane.f32.xlu0 %v353_v39 }
 0x277   :  { %v354_v28 = vmul.f32 %v350_v40, %v350_v40 }
 0x279   :  { %361 = vadd.xlane.f32.xlu1 %v354_v28 }
 0x2fa   :  { %v356_v41 = vpop.xlane.xlu0 %355 }
 0x2fb   :  { %v363_v42 = vmul.f32 0.0078125, %v356_v41 }
 0x2fd   :  { %v367_v43 = vadd.f32 1e-05, %v363_v42 }
 0x2fe   :  { %v358_v44 = vpop.xlane.xlu1 %357 }
 0x2ff   :  { %521 = vrsqrt.f32 %v367_v43  ;;  %v364_v45 = vmul.f32 0.0078125, %v358_v44 }
 0x301   :  { %v368_v46 = vadd.f32 1e-05, %v364_v45 }
 0x302   :  { %v360_v47 = vpop.xlane.xlu0 %359 }
 0x303   :  { %523 = vrsqrt.f32 %v368_v46  ;;  %v365_v48 = vmul.f32 0.0078125, %v360_v47 }
 0x305   :  { %v369_v49 = vadd.f32 1e-05, %v365_v48 }
 0x306   :  { %v362_v50 = vpop.xlane.xlu1 %361 }
 0x307   :  { %525 = vrsqrt.f32 %v369_v49  ;;  %v366_v51 = vmul.f32 0.0078125, %v362_v50 }
 0x309   :  { %v522_v52 = vpop.eup %521  ;;  %v370_v54 = vadd.f32 1e-05, %v366_v51 }
 0x30a   :  { %v375_v55 = vmul.f32 %v522_v52, %v347_v31 }
 0x30b   :  { %527 = vrsqrt.f32 %v370_v54 }
 0x30c   :  { %v386_v57 = vmul.f32 %v410_v53, %v375_v55 }
 0x30d   :  { %v524_v58 = vpop.eup %523 }
 0x30e   :  { %v397_v59 = vadd.f32 %v411_v56, %v386_v57  ;;  %v376_v60 = vmul.f32 %v524_v58, %v348_v34 }
 0x310   :  { %401 = vst [vmem:[%s825_s7] sm:$0xff] %v397_v59  ;;  %v387_v61 = vmul.f32 %v410_v53, %v376_v60 }
 0x311   :  { %v526_v62 = vpop.eup %525 }
 0x312   :  { %v398_v63 = vadd.f32 %v411_v56, %v387_v61  ;;  %v377_v0 = vmul.f32 %v526_v62, %v349_v37 }
 0x314   :  { %402 = vst [vmem:[%s825_s7 + $0x8] sm:$0xff] %v398_v63  ;;  %v388_v1 = vmul.f32 %v410_v53, %v377_v0 }
 0x315   :  { %v528_v2 = vpop.eup %527 }
 0x316   :  { %v399_v4 = vadd.f32 %v411_v56, %v388_v1  ;;  %v378_v5 = vmul.f32 %v528_v2, %v350_v40 }
 0x318   :  { %403 = vst [vmem:[%s825_s7 + $0x10] sm:$0xff] %v399_v4  ;;  %v389_v6 = vmul.f32 %v410_v53, %v378_v5 }
 0x31a   :  { %v400_v7 = vadd.f32 %v411_v56, %v389_v6 }
 0x31c   :  { %404 = vst [vmem:[%s825_s7 + $0x18] sm:$0xff] %v400_v7 }

</bundles_post_ra>
